<compile_context>
chip_gen: v7x
topology: tpu7x:2x2x1
jax: 0.10.0
libtpu: 0.0.40
codegen_flags: <defaults>
</compile_context>

<pallas_src>
import functools

import jax
import jax.numpy as jnp
from jax import lax
from jax.experimental import pallas as pl
from jax.experimental.pallas import tpu as pltpu


def _round_up(x, m):
    return (x + m - 1) // m * m


def _vmem_cap_bytes():
    try:
        cap = int(pltpu.get_tpu_info().vmem_capacity_bytes)
        if cap > 0:
            return cap
    except Exception:
        pass
    return 64 * 1024 * 1024  # conservative: v7x per-TensorCore VMEM


def _block_vmem_bytes(th, wo_p, stride, k, c, oc):
    """Lane/sublane-padded VMEM footprint of one grid step (conservative)."""
    span_h = (th - 1) * stride + k
    wp_eff = (wo_p - 1) * stride + k
    m = th * wo_p
    kkc = k * k * c
    lane = lambda v: _round_up(v, 128)
    sub = lambda v: _round_up(v, 16)           # bf16 sublane tile
    x_blk = span_h * sub(wp_eff) * lane(c) * 2          # bf16 input halo block
    o_blk = sub(m) * lane(oc) * 2                        # bf16 output block
    w_buf = sub(kkc) * lane(oc) * 2
    b_buf = 8 * lane(oc) * 4
    patch = sub(m) * lane(kkc) * 2                       # fused matmul operand
    taps = k * k * sub(m) * lane(c) * 2                  # tap slices (upper bound)
    res = sub(m) * lane(oc) * 4                          # f32 matmul result
    return 2 * (x_blk + o_blk) + 2 * (w_buf + b_buf) + patch + taps + res


def _pick_th(ho, wo_p, stride, k, c, oc, budget, target_m=1024):
    th = max(1, min(ho, max(1, target_m // wo_p)))
    while th > 1 and _block_vmem_bytes(th, wo_p, stride, k, c, oc) > budget:
        th -= 1
    return th


def _conv_kernel(x_ref, w_ref, b_ref, o_ref, *, k, stride, th, wo_p):
    # x_ref: (span_h, Wp_eff, C) bf16 halo-row block for this (image, Ho-block)
    # w_ref: (K*K*C, OC)         bf16
    # b_ref: (1, OC)             f32
    # o_ref: (th*Wo_p, OC)       bf16
    c = x_ref.shape[-1]
    m = th * wo_p
    taps = []
    for kh in range(k):
        for kw in range(k):
            if stride == 1:
                xs = x_ref[pl.ds(kh, th), pl.ds(kw, wo_p), :]
            else:
                xs = x_ref[pl.ds(kh, th, stride), pl.ds(kw, wo_p, stride), :]
            taps.append(xs.reshape(m, c))
    patch = jnp.concatenate(taps, axis=-1)               # (m, K*K*C) bf16
    res = jnp.dot(patch, w_ref[...], preferred_element_type=jnp.float32)
    o_ref[...] = (res + b_ref[...]).astype(o_ref.dtype)


@functools.partial(jax.jit, static_argnames=("kernel_size", "stride"))
def conv_layer_forward(x, weight, bias, *, kernel_size, stride):
    """ConvLayer.forward: ReflectionPad2d(kernel_size//2) then Conv2d(..., stride).

    x:      (N, C, H, W)    float32 NCHW
    weight: (OC, C, K, K)   float32 OIHW
    bias:   (OC,)           float32
    returns (N, OC, Ho, Wo) float32 NCHW
    """
    n, c, h, w = x.shape
    oc, _, k, _ = weight.shape
    assert k == kernel_size
    pad = k // 2
    ho = (h + 2 * pad - k) // stride + 1
    wo = (w + 2 * pad - k) // stride + 1

    wo_p = _round_up(wo, 16)                  # bf16 sublane-tile aligned output width
    kkc = k * k * c

    cap = _vmem_cap_bytes()
    th = _pick_th(ho, wo_p, stride, k, c, oc, budget=int(0.45 * cap))
    n_hblk = pl.cdiv(ho, th)
    ho_p = n_hblk * th
    span_h = (th - 1) * stride + k
    wp_eff = (wo_p - 1) * stride + k

    # --- wrapper-side layout prep (small, un-inflated input) ---
    # NCHW -> NHWC bf16, reflect-pad width, zero-pad right edge to Wp_eff.
    x_nhwc = jnp.transpose(x, (0, 2, 3, 1)).astype(jnp.bfloat16)
    x_wpad = jnp.pad(x_nhwc, ((0, 0), (0, 0), (pad, pad), (0, 0)), mode="reflect")
    wp = w + 2 * pad
    if wp_eff > wp:
        x_wpad = jnp.pad(x_wpad, ((0, 0), (0, 0), (0, wp_eff - wp), (0, 0)))

    # Halo-row gather: Ho-block j needs padded rows [j*th*s, j*th*s + span_h).
    # H reflection + tail clamping folded into the indices.
    row = (jnp.arange(n_hblk, dtype=jnp.int32)[:, None] * (th * stride)
           + jnp.arange(span_h, dtype=jnp.int32)[None, :]) - pad
    row = jnp.abs(row)
    row = jnp.where(row > h - 1, 2 * (h - 1) - row, row)
    row = jnp.clip(row, 0, h - 1)
    x_blocks = jnp.take(x_wpad, row, axis=1)   # (N, n_hblk, span_h, Wp_eff, C)

    # Weights -> (K*K*C, OC) with (kh, kw, c) row order matching the in-kernel
    # tap concatenation order; bias -> (1, OC) f32.
    w_r = jnp.transpose(weight, (2, 3, 1, 0)).reshape(kkc, oc).astype(jnp.bfloat16)
    b_r = bias.reshape(1, oc).astype(jnp.float32)

    est = _block_vmem_bytes(th, wo_p, stride, k, c, oc)
    vmem_limit = int(min(cap - 4 * 1024 * 1024,
                         max(32 * 1024 * 1024, est + 8 * 1024 * 1024)))

    kernel = functools.partial(_conv_kernel, k=k, stride=stride, th=th, wo_p=wo_p)

    out_flat = pl.pallas_call(
        kernel,
        out_shape=jax.ShapeDtypeStruct((n, ho_p * wo_p, oc), jnp.bfloat16),
        grid_spec=pltpu.PrefetchScalarGridSpec(
            num_scalar_prefetch=0,
            grid=(n, n_hblk),
            in_specs=[
                pl.BlockSpec((None, None, span_h, wp_eff, c),
                             lambda i, j: (i, j, 0, 0, 0)),
                pl.BlockSpec((kkc, oc), lambda i, j: (0, 0)),
                pl.BlockSpec((1, oc), lambda i, j: (0, 0)),
            ],
            out_specs=pl.BlockSpec((None, th * wo_p, oc), lambda i, j: (i, j, 0)),
        ),
        compiler_params=pltpu.CompilerParams(
            dimension_semantics=("parallel", "parallel"),
            vmem_limit_bytes=vmem_limit),
    )(x_blocks, w_r, b_r)

    # Boundary conversion back to the module contract (NCHW, f32).  When
    # chaining ConvLayers, keep the flat (N, Ho_p*Wo_p, OC) NHWC layout instead.
    out = out_flat.reshape(n, ho_p, wo_p, oc)[:, :ho, :wo, :].astype(jnp.float32)
    return jnp.transpose(out, (0, 3, 1, 2))


if __name__ == "__main__":
    in_channels, out_channels = 4, 8
    kernel_size, stride = 3, 1
    N, H, W = 2, 16, 16

    key = jax.random.PRNGKey(0)
    kx, kwgt, kb = jax.random.split(key, 3)
    x = jax.random.normal(kx, (N, in_channels, H, W), dtype=jnp.float32)
    weight = 0.1 * jax.random.normal(
        kwgt, (out_channels, in_channels, kernel_size, kernel_size), dtype=jnp.float32)
    bias = 0.1 * jax.random.normal(kb, (out_channels,), dtype=jnp.float32)

    out = conv_layer_forward(x, weight, bias,
                             kernel_size=kernel_size, stride=stride)
    out = jax.block_until_ready(out)

    # f32 reference; kernel uses bf16 operands/output with f32 accumulation,
    # hence the looser tolerance.
    pad = kernel_size // 2
    x_pad = jnp.pad(x, ((0, 0), (0, 0), (pad, pad), (pad, pad)), mode="reflect")
    ref = lax.conv_general_dilated(
        x_pad, weight, window_strides=(stride, stride), padding="VALID",
        dimension_numbers=("NCHW", "OIHW", "NCHW")) + bias.reshape(1, -1, 1, 1)
    assert out.shape == ref.shape, (out.shape, ref.shape)
    assert jnp.allclose(out, ref, atol=5e-2, rtol=5e-2), \
        float(jnp.max(jnp.abs(out - ref)))

    print("KERNEL_OK")
</pallas_src>

<mosaic_0001>
module attributes {stable_mosaic.version = 11 : i64} {
  func.func @_conv_kernel(%arg0: i32, %arg1: i32, %arg2: memref<1x1x18x18x4xbf16, #tpu.memory_space<vmem>>, %arg3: memref<36x8xbf16, #tpu.memory_space<vmem>>, %arg4: memref<1x8xf32, #tpu.memory_space<vmem>>, %arg5: memref<1x256x8xbf16, #tpu.memory_space<vmem>>) attributes {dimension_semantics = [#tpu.dimension_semantics<parallel>, #tpu.dimension_semantics<parallel>], iteration_bounds = array<i64: 2, 1>, scalar_prefetch = 0 : i64, scratch_operands = 0 : i64, tpu.core_type = #tpu.core_type<tc>, window_params = [{transform_indices = @transform_0, window_bounds = array<i64: 1, 1, 18, 18, 4>}, {pipeline_mode = #tpu.pipeline_mode<synchronous>, transform_indices = @transform_1, window_bounds = array<i64: 36, 8>}, {pipeline_mode = #tpu.pipeline_mode<synchronous>, transform_indices = @transform_2, window_bounds = array<i64: 1, 8>}, {transform_indices = @transform_3, window_bounds = array<i64: 1, 256, 8>}]} {
    %c0 = arith.constant 0 : index
    %c0_0 = arith.constant 0 : index
    %c0_1 = arith.constant 0 : index
    %c0_2 = arith.constant 0 : index
    %c0_3 = arith.constant 0 : index
    %0 = vector.load %arg2[%c0, %c0_0, %c0_1, %c0_2, %c0_3] : memref<1x1x18x18x4xbf16, #tpu.memory_space<vmem>>, vector<1x1x16x16x4xbf16>
    %1 = vector.shape_cast %0 : vector<1x1x16x16x4xbf16> to vector<16x16x4xbf16>
    %2 = vector.shape_cast %1 : vector<16x16x4xbf16> to vector<256x4xbf16>
    %c0_4 = arith.constant 0 : index
    %c0_5 = arith.constant 0 : index
    %c0_6 = arith.constant 0 : index
    %c1 = arith.constant 1 : index
    %c0_7 = arith.constant 0 : index
    %3 = vector.load %arg2[%c0_4, %c0_5, %c0_6, %c1, %c0_7] : memref<1x1x18x18x4xbf16, #tpu.memory_space<vmem>>, vector<1x1x16x16x4xbf16>
    %4 = vector.shape_cast %3 : vector<1x1x16x16x4xbf16> to vector<16x16x4xbf16>
    %5 = vector.shape_cast %4 : vector<16x16x4xbf16> to vector<256x4xbf16>
    %c0_8 = arith.constant 0 : index
    %c0_9 = arith.constant 0 : index
    %c0_10 = arith.constant 0 : index
    %c2 = arith.constant 2 : index
    %c0_11 = arith.constant 0 : index
    %6 = vector.load %arg2[%c0_8, %c0_9, %c0_10, %c2, %c0_11] : memref<1x1x18x18x4xbf16, #tpu.memory_space<vmem>>, vector<1x1x16x16x4xbf16>
    %7 = vector.shape_cast %6 : vector<1x1x16x16x4xbf16> to vector<16x16x4xbf16>
    %8 = vector.shape_cast %7 : vector<16x16x4xbf16> to vector<256x4xbf16>
    %c0_12 = arith.constant 0 : index
    %c0_13 = arith.constant 0 : index
    %c1_14 = arith.constant 1 : index
    %c0_15 = arith.constant 0 : index
    %c0_16 = arith.constant 0 : index
    %9 = vector.load %arg2[%c0_12, %c0_13, %c1_14, %c0_15, %c0_16] : memref<1x1x18x18x4xbf16, #tpu.memory_space<vmem>>, vector<1x1x16x16x4xbf16>
    %10 = vector.shape_cast %9 : vector<1x1x16x16x4xbf16> to vector<16x16x4xbf16>
    %11 = vector.shape_cast %10 : vector<16x16x4xbf16> to vector<256x4xbf16>
    %c0_17 = arith.constant 0 : index
    %c0_18 = arith.constant 0 : index
    %c1_19 = arith.constant 1 : index
    %c1_20 = arith.constant 1 : index
    %c0_21 = arith.constant 0 : index
    %12 = vector.load %arg2[%c0_17, %c0_18, %c1_19, %c1_20, %c0_21] : memref<1x1x18x18x4xbf16, #tpu.memory_space<vmem>>, vector<1x1x16x16x4xbf16>
    %13 = vector.shape_cast %12 : vector<1x1x16x16x4xbf16> to vector<16x16x4xbf16>
    %14 = vector.shape_cast %13 : vector<16x16x4xbf16> to vector<256x4xbf16>
    %c0_22 = arith.constant 0 : index
    %c0_23 = arith.constant 0 : index
    %c1_24 = arith.constant 1 : index
    %c2_25 = arith.constant 2 : index
    %c0_26 = arith.constant 0 : index
    %15 = vector.load %arg2[%c0_22, %c0_23, %c1_24, %c2_25, %c0_26] : memref<1x1x18x18x4xbf16, #tpu.memory_space<vmem>>, vector<1x1x16x16x4xbf16>
    %16 = vector.shape_cast %15 : vector<1x1x16x16x4xbf16> to vector<16x16x4xbf16>
    %17 = vector.shape_cast %16 : vector<16x16x4xbf16> to vector<256x4xbf16>
    %c0_27 = arith.constant 0 : index
    %c0_28 = arith.constant 0 : index
    %c2_29 = arith.constant 2 : index
    %c0_30 = arith.constant 0 : index
    %c0_31 = arith.constant 0 : index
    %18 = vector.load %arg2[%c0_27, %c0_28, %c2_29, %c0_30, %c0_31] : memref<1x1x18x18x4xbf16, #tpu.memory_space<vmem>>, vector<1x1x16x16x4xbf16>
    %19 = vector.shape_cast %18 : vector<1x1x16x16x4xbf16> to vector<16x16x4xbf16>
    %20 = vector.shape_cast %19 : vector<16x16x4xbf16> to vector<256x4xbf16>
    %c0_32 = arith.constant 0 : index
    %c0_33 = arith.constant 0 : index
    %c2_34 = arith.constant 2 : index
    %c1_35 = arith.constant 1 : index
    %c0_36 = arith.constant 0 : index
    %21 = vector.load %arg2[%c0_32, %c0_33, %c2_34, %c1_35, %c0_36] : memref<1x1x18x18x4xbf16, #tpu.memory_space<vmem>>, vector<1x1x16x16x4xbf16>
    %22 = vector.shape_cast %21 : vector<1x1x16x16x4xbf16> to vector<16x16x4xbf16>
    %23 = vector.shape_cast %22 : vector<16x16x4xbf16> to vector<256x4xbf16>
    %c0_37 = arith.constant 0 : index
    %c0_38 = arith.constant 0 : index
    %c2_39 = arith.constant 2 : index
    %c2_40 = arith.constant 2 : index
    %c0_41 = arith.constant 0 : index
    %24 = vector.load %arg2[%c0_37, %c0_38, %c2_39, %c2_40, %c0_41] : memref<1x1x18x18x4xbf16, #tpu.memory_space<vmem>>, vector<1x1x16x16x4xbf16>
    %25 = vector.shape_cast %24 : vector<1x1x16x16x4xbf16> to vector<16x16x4xbf16>
    %26 = vector.shape_cast %25 : vector<16x16x4xbf16> to vector<256x4xbf16>
    %27 = tpu.concatenate %2, %5, %8, %11, %14, %17, %20, %23, %26 in 1 : vector<256x4xbf16>, vector<256x4xbf16>, vector<256x4xbf16>, vector<256x4xbf16>, vector<256x4xbf16>, vector<256x4xbf16>, vector<256x4xbf16>, vector<256x4xbf16>, vector<256x4xbf16> -> vector<256x36xbf16>
    %c0_42 = arith.constant 0 : index
    %c0_43 = arith.constant 0 : index
    %28 = vector.load %arg3[%c0_42, %c0_43] : memref<36x8xbf16, #tpu.memory_space<vmem>>, vector<36x8xbf16>
    %cst = arith.constant dense<0.000000e+00> : vector<256x8xf32>
    %29 = tpu.matmul %27, %28, %cst {dimension_numbers = #tpu.dot_dimension_numbers<[1], [0], [0], [1], [0, 0, 1, 1], [], []>} : vector<256x36xbf16>, vector<36x8xbf16>, vector<256x8xf32> -> vector<256x8xf32>
    %c0_44 = arith.constant 0 : index
    %c0_45 = arith.constant 0 : index
    %30 = vector.load %arg4[%c0_44, %c0_45] : memref<1x8xf32, #tpu.memory_space<vmem>>, vector<1x8xf32>
    %31 = vector.broadcast %30 : vector<1x8xf32> to vector<256x8xf32>
    %32 = arith.addf %29, %31 : vector<256x8xf32>
    %33 = arith.truncf %32 : vector<256x8xf32> to vector<256x8xbf16>
    %c0_46 = arith.constant 0 : index
    %c0_47 = arith.constant 0 : index
    %c0_48 = arith.constant 0 : index
    %34 = vector.load %arg5[%c0_46, %c0_47, %c0_48] : memref<1x256x8xbf16, #tpu.memory_space<vmem>>, vector<1x256x8xbf16>
    %35 = vector.shape_cast %34 : vector<1x256x8xbf16> to vector<256x8xbf16>
    %36 = vector.shape_cast %33 : vector<256x8xbf16> to vector<1x256x8xbf16>
    tpu.vector_store %arg5[%c0_46, %c0_47, %c0_48], %36 {strides = array<i32>} : memref<1x256x8xbf16, #tpu.memory_space<vmem>>, vector<1x256x8xbf16>,
    return
  }
  func.func @transform_0(%arg0: i32, %arg1: i32) -> (i32, i32, i32, i32, i32) {
    %c0_i32 = arith.constant 0 : i32
    %c0_i32_0 = arith.constant 0 : i32
    %c0_i32_1 = arith.constant 0 : i32
    %c0_i32_2 = arith.constant 0 : i32
    return %arg0, %arg1, %c0_i32, %c0_i32_0, %c0_i32_1 : i32, i32, i32, i32, i32
  }
  func.func @transform_1(%arg0: i32, %arg1: i32) -> (i32, i32) {
    %c0_i32 = arith.constant 0 : i32
    %c0_i32_0 = arith.constant 0 : i32
    %c0_i32_1 = arith.constant 0 : i32
    return %c0_i32, %c0_i32_0 : i32, i32
  }
  func.func @transform_2(%arg0: i32, %arg1: i32) -> (i32, i32) {
    %c0_i32 = arith.constant 0 : i32
    %c0_i32_0 = arith.constant 0 : i32
    %c0_i32_1 = arith.constant 0 : i32
    return %c0_i32, %c0_i32_0 : i32, i32
  }
  func.func @transform_3(%arg0: i32, %arg1: i32) -> (i32, i32, i32) {
    %c0_i32 = arith.constant 0 : i32
    %c0_i32_0 = arith.constant 0 : i32
    return %arg0, %arg1, %c0_i32 : i32, i32, i32
  }
}

</mosaic_0001>

<bundles_post_ra>
// kernel: conv_layer_forward.1
= control target key start
LH: loop header
LB: loop body
LE: loop exit
PB: predicated region body
PF: predicated region fallthrough
CT: control target
= control target key end

     0   :  { %s4177_s12 = smov 0   ;;  %s4179_s13 = smov 0   ;;  %s6125_s0 = inlined_call_operand.vmem [shape: bf16[2,1,18,18,4], index: 0, kind: input, shape index: {}]   ;;  %s6126_s1 = inlined_call_operand.vmem [shape: bf16[36,8], index: 1, kind: input, shape index: {}]   ;;  %s6127_s2 = inlined_call_operand.vmem [shape: f32[1,8], index: 2, kind: input, shape index: {}]   ;;  %s6128_s3 = inlined_call_operand.vmem [shape: bf16[2,256,8], index: 3, kind: output, shape index: {}]  }
   0x1   :  { %s4181_s14 = smov 0  }
   0x2 LB: > { %s25_s15 = sadd.s32 1, %s4143_s13  ;;  %p3537_p0 = scmp.ge.s32.totalorder %s4147_s14, 1  ;;  %s4147_s14 = sphi %s4181_s14, %s13_s14   ;;  %s4143_s13 = sphi %s4179_s13, %s6134_s13   ;;  %s4139_s12 = sphi %s4177_s12, %s6133_s12  }
   0x3   : > { %p27_p1 = scmp.ge.s32.totalorder %s25_s15, 2  ;;  %p157_p2 = scmp.lt.s32.totalorder %s4147_s14, 3 }
   0x5   : > { %s6136_s15 = smov (%p27_p1, %s25_s15), 0  ;;  %p158_p3 = pnand %p3537_p0, %p157_p2 }
   0x6   : > { %p189_p4 = scmp.lt.s32.totalorder (!%p158_p3), %s4139_s12, 1  ;;  %vm708_vm0 = vcmask (!%p158_p3), 1042432   ;;  %vm709_vm1 = vcmask (!%p158_p3), 1046532   ;;  %s4149_s20 = smov (!%p158_p3), 12   ;;  %vm257_vm3 = vsmask.f32 (!%p158_p3), 3328 }
   0x7   : > { %161 = sbr.rel (%p158_p3) target bundleno = 677 (0x2a5), region = 32  ;;  %vm4232_vm2 = vmor (!%p158_p3), %vm708_vm0, %vm709_vm1  ;;  %vm258_vm4 = vsmask.f32 (!%p158_p3), 7440  ;;  %s4150_s21 = smov (!%p158_p3), 8   ;;  %vm2777_vm6 = vcmask (!%p158_p3), 31744   ;;  %vm2826_vm7 = vcmask (!%p158_p3), 64512  }
   0x8   : > { %vm4290_vm5 = vmor (!%p158_p3), %vm257_vm3, %vm258_vm4  ;;  %s4151_s22 = smov (!%p158_p3), 4   ;;  %s4152_s23 = smov (!%p158_p3), 16   ;;  %vm2859_vm8 = vcmask (!%p158_p3), 97280   ;;  %vm2892_vm9 = vcmask (!%p158_p3), 130048   ;;  %vm2925_vm10 = vcmask (!%p158_p3), 162816   ;;  %vm2958_vm11 = vcmask (!%p158_p3), 195584  }
   0x9   : > { %s4153_s24 = smov (!%p158_p3), 20   ;;  %s4154_s25 = smov (!%p158_p3), 24   ;;  %vm2991_vm12 = vcmask (!%p158_p3), 228352   ;;  %vm3024_vm13 = vcmask (!%p158_p3), 261120   ;;  %vm3084_vm14 = vcmask (!%p158_p3), 293888   ;;  %vm3117_vm15 = vcmask (!%p158_p3), 1041408  }
   0xa   : > { %s4155_s26 = smov (!%p158_p3), 28   ;;  %s4156_s27 = smov (!%p158_p3), 32   ;;  %vm3410_vm0 = vcmask (!%p158_p3), 60416  }
   0xe   : > { %s6138_s12 = smov (!%p189_p4, %s4139_s12), 1 }
   0xf   : > { %s4013_s16 = smul.u32 216, %s6138_s12  ;;  %s3915_s9 = sshll.u32 %s6138_s12, 7 }
  0x10   : > { %s6009_s12 = scalar_lea.vmem %s6128_s3, %s3915_s9 }
  0x11   : > { %s4201_s19 = scalar_lea.vmem %s6125_s0, %s4013_s16 }
  0x12   : > { %v3573_v0 = vld [vmem:[%s4201_s19 + $0x6c] sm:$0xf]  ;;  %v4205_v1 = vld [vmem:[%s4201_s19 + $0x70] sm:$0xf]  ;;  %v4218_v12 = vld [vmem:[%s4201_s19 + $0x64] sm:$0xf] }
  0x13   : > { %v3557_v2 = vld [vmem:[%s4201_s19 + $0xc] sm:$0xf]  ;;  %v1074_v3 = vshll.u32 %v4205_v1, 16  ;;  %v1078_v4 = vshrl.u32 %v4205_v1, 16  ;;  %v3773_v5 = vcombine.low %v3573_v0, %v4205_v1  ;;  %v1065_v6 = vshrl.u32 %v3573_v0, 16 }
  0x14   : > { %v4212_v7 = vld [vmem:[%s4201_s19 + $0x10] sm:$0xf]  ;;  %v1068_v8 = vshll.u32 %v3573_v0, 16  ;;  %v873_v15 = vshrl.u32 %v3557_v2, 16  ;;  %v876_v16 = vshll.u32 %v3557_v2, 16  ;;  %v769_v22 = vrot.slane %v4218_v12, 5 }
  0x15   : > { %v882_v9 = vshll.u32 %v4212_v7, 16  ;;  %v886_v10 = vshrl.u32 %v4212_v7, 16  ;;  %v3765_v11 = vcombine.low %v3557_v2, %v4212_v7  ;;  %v4220_v13 = vrot.slane %v1078_v4, 4  ;;  %2345 = vrot.lane.b32.xlu1 %v3773_v5, %s4149_s20  ;;  %v4224_v17 = vld [vmem:[%s4201_s19 + $0x68] sm:$0x1] }
  0x16   : > { %v1067_v14 = vrot.slane %v1065_v6, 4  ;;  %v1070_v18 = vrot.slane %v1068_v8, 5  ;;  %v652_v20 = vld [vmem:[%s4201_s19 + $0x60] sm:$0xe]  ;;  %v772_v23 = vrot.slane %v4224_v17, 5  ;;  %v875_v24 = vrot.slane %v873_v15, 4 }
  0x17   : > { %v4226_v19 = vrot.slane %v886_v10, 4  ;;  %2329 = vrot.lane.b32.xlu0 %v3765_v11, %s4149_s20  ;;  %v878_v25 = vrot.slane %v876_v16, 5  ;;  %v3549_v26 = vrot.slane %v652_v20, 9  ;;  %v4239_v27 = vld [vmem:[%s4201_s19 + $0x4] sm:$0xf]  ;;  %v462_v28 = vshll.u32 %v4218_v12, 16 }
  0x18   : > { %v1071_v29 = vor.u32 %v1070_v18, %v1067_v14  ;;  %v771_v30 = vrot.slane %v769_v22, 4  ;;  %v4243_v31 = vld [vmem:[%s4201_s19 + $0x8] sm:$0x1]  ;;  %v644_v32 = vld [vmem:[%s4201_s19] sm:$0xe]  ;;  %v713_v33 = vrot.slane %v4239_v27, 5 }
  0x19   : > { %v879_v34 = vor.u32 %v878_v25, %v875_v24  ;;  %v770_v35 = vsel %vm4232_vm2, %v3549_v26, %v769_v22  ;;  %v3541_v36 = vrot.slane %v644_v32, 9  ;;  %v716_v37 = vrot.slane %v4243_v31, 5  ;;  %v4251_v38 = vld [vmem:[%s4201_s19 + $0x70] sm:$0xf]  ;;  %v4254_v39 = vld [vmem:[%s4201_s19 + $0x74] sm:$0x1] }
  0x1a   : > { %v4256_v40 = vrot.slane %v1071_v29, 4  ;;  %v773_v41 = vsel %vm4232_vm2, %v771_v30, %v772_v23  ;;  %v715_v42 = vrot.slane %v713_v33, 4  ;;  %v653_v43 = vld [vmem:[%s4201_s19 + $0x6c] sm:$0xe]  ;;  %v776_v44 = vrot.slane %v4251_v38, 5 }
  0x1b   : > { %v4262_v45 = vrot.slane %v879_v34, 4  ;;  %v3757_v46 = vcombine.low %v770_v35, %v773_v41  ;;  %v714_v47 = vsel %vm4232_vm2, %v3541_v36, %v713_v33  ;;  %v3550_v48 = vrot.slane %v653_v43, 9  ;;  %v212_v49 = vld [vmem:[%s4201_s19 + $0x10] sm:$0xf]  ;;  %v242_v50 = vld [vmem:[%s4201_s19 + $0x14] sm:$0x1] }
  0x1c   : > { %v717_v51 = vsel %vm4232_vm2, %v715_v42, %v716_v37  ;;  %v778_v52 = vrot.slane %v776_v44, 4  ;;  %v779_v53 = vrot.slane %v4254_v39, 5  ;;  %v645_v54 = vld [vmem:[%s4201_s19 + $0xc] sm:$0xe]  ;;  %v720_v55 = vrot.slane %v212_v49, 5 }
  0x1d   : > { %2249 = vrot.lane.b32.xlu1 %v3757_v46, %s4150_s21  ;;  %v3749_v56 = vcombine.low %v714_v47, %v717_v51  ;;  %v777_v57 = vsel %vm4232_vm2, %v3550_v48, %v776_v44  ;;  %v3542_v58 = vrot.slane %v645_v54, 9  ;;  %v723_v59 = vrot.slane %v242_v50, 5  ;;  %v211_v60 = vld [vmem:[%s4201_s19 + $0xc] sm:$0xf]  ;;  %v209_v2 = vld [vmem:[%s4201_s19] sm:$0xf] }
  0x1e   : > { %v780_v61 = vsel %vm4232_vm2, %v778_v52, %v779_v53  ;;  %v722_v62 = vrot.slane %v720_v55, 4  ;;  %v285_v63 = vshrl.u32 %v211_v60, 16  ;;  %v288_v0 = vshll.u32 %v211_v60, 16  ;;  %v227_v23 = vld [vmem:[%s4201_s19 + $0x6c] sm:$0xf] }
  0x1f   : > { %2233 = vrot.lane.b32.xlu0 %v3749_v56, %s4150_s21  ;;  %v3758_v4 = vcombine.low %v777_v57, %v780_v61  ;;  %v721_v5 = vsel %vm4232_vm2, %v3542_v58, %v720_v55  ;;  %v294_v6 = vshll.u32 %v212_v49, 16  ;;  %v298_v8 = vshrl.u32 %v212_v49, 16  ;;  %v225_v52 = vld [vmem:[%s4201_s19 + $0x60] sm:$0xf] }
  0x20   : > { %v724_v10 = vsel %vm4232_vm2, %v722_v62, %v723_v59  ;;  %v287_v11 = vrot.slane %v285_v63, 4  ;;  %v290_v14 = vrot.slane %v288_v0, 5  ;;  %v304_v15 = vshll.u32 %v242_v50, 16 }
  0x21   : > { %2251 = vrot.lane.b32.xlu1 %v3758_v4, %s4150_s21  ;;  %v3750_v16 = vcombine.low %v721_v5, %v724_v10  ;;  %v296_v18 = vrot.slane %v294_v6, 5  ;;  %v300_v20 = vrot.slane %v298_v8, 4  ;;  %v261_v22 = vshrl.u32 %v209_v2, 16  ;;  %v3575_v4 = vld [vmem:[%s4201_s19 + $0x78] sm:$0xf] }
  0x22   : > { %v291_v24 = vor.u32 %v290_v14, %v287_v11  ;;  %v306_v25 = vrot.slane %v304_v15, 5  ;;  %v264_v26 = vshll.u32 %v209_v2, 16  ;;  %v270_v29 = vshll.u32 %v4239_v27, 16  ;;  %v4313_v10 = vld [vmem:[%s4201_s19 + $0x7c] sm:$0xf] }
  0x23   : > { %2235 = vrot.lane.b32.xlu0 %v3750_v16, %s4150_s21  ;;  %v301_v32 = vor.u32 %v300_v20, %v296_v18  ;;  %v263_v33 = vrot.slane %v261_v22, 4  ;;  %v274_v34 = vshrl.u32 %v4239_v27, 16  ;;  %v280_v35 = vshll.u32 %v4243_v31, 16 }
  0x24   : > { %v292_v36 = vrot.slane %v291_v24, 4  ;;  %v266_v37 = vrot.slane %v264_v26, 5  ;;  %v272_v41 = vrot.slane %v270_v29, 5  ;;  %v477_v42 = vshrl.u32 %v227_v23, 16 }
  0x25   : > { %v302_v43 = vrot.slane %v301_v32, 4  ;;  %v276_v44 = vrot.slane %v274_v34, 4  ;;  %v282_v46 = vrot.slane %v280_v35, 5  ;;  %v480_v47 = vshll.u32 %v227_v23, 16  ;;  %v4320_v23 = vld [vmem:[%s4201_s19 + $0x18] sm:$0xf] }
  0x26   : > { %v297_v48 = vsel %vm4290_vm5, %v292_v36, %v296_v18  ;;  %v267_v49 = vor.u32 %v266_v37, %v263_v33  ;;  %v479_v50 = vrot.slane %v477_v42, 4  ;;  %v486_v51 = vshll.u32 %v4251_v38, 16  ;;  %v4331_v35 = vld [vmem:[%s4201_s19 + $0x74] sm:$0x1] }
  0x27   : > { %v307_v27 = vsel %vm4290_vm5, %v302_v43, %v306_v25  ;;  %v277_v31 = vor.u32 %v276_v44, %v272_v41  ;;  %v482_v53 = vrot.slane %v480_v47, 5  ;;  %v490_v54 = vshrl.u32 %v4251_v38, 16 }
  0x28   : > { %v3734_v55 = vcombine.low %v297_v48, %v307_v27  ;;  %v268_v56 = vrot.slane %v267_v49, 4  ;;  %v488_v57 = vrot.slane %v486_v51, 5  ;;  %v496_v58 = vshll.u32 %v4254_v39, 16  ;;  %v4341_v48 = vld [vmem:[%s4201_s19 + $0x14] sm:$0x1] }
  0x29   : > { %v278_v59 = vrot.slane %v277_v31, 4  ;;  %v483_v60 = vor.u32 %v482_v53, %v479_v50  ;;  %v492_v61 = vrot.slane %v490_v54, 4  ;;  %v453_v62 = vshrl.u32 %v225_v52, 16 }
  0x2a   : > { %2155 = vrot.lane.b32.xlu1 %v3734_v55, %s4151_s22  ;;  %v273_v63 = vsel %vm4290_vm5, %v268_v56, %v272_v41  ;;  %v498_v0 = vrot.slane %v496_v58, 5  ;;  %v456_v2 = vshll.u32 %v225_v52, 16  ;;  %v464_v38 = vrot.slane %v462_v28, 5 }
  0x2b   : > { %v283_v39 = vsel %vm4290_vm5, %v278_v59, %v282_v46  ;;  %v484_v5 = vrot.slane %v483_v60, 4  ;;  %v493_v6 = vor.u32 %v492_v61, %v488_v57  ;;  %v455_v8 = vrot.slane %v453_v62, 4 }
  0x2c   : > { %v3733_v11 = vcombine.low %v273_v63, %v283_v39  ;;  %v458_v14 = vrot.slane %v456_v2, 5  ;;  %v466_v15 = vshrl.u32 %v4218_v12, 16  ;;  %v472_v16 = vshll.u32 %v4224_v17, 16  ;;  %v4325_v12 = vld [vmem:[%s4201_s19 + $0x1c] sm:$0xf] }
  0x2d   : > { %v489_v28 = vsel %vm4290_vm5, %v484_v5, %v488_v57  ;;  %v494_v18 = vrot.slane %v493_v6, 4  ;;  %v1089_v20 = vshrl.u32 %v3575_v4, 16  ;;  %v1092_v22 = vshll.u32 %v3575_v4, 16  ;;  %v4357_v57 = vld [vmem:[%s4201_s19 + $0x80] sm:$0x1] }
  0x2e   : > { %2153 = vrot.lane.b32.xlu0 %v3733_v11, %s4151_s22  ;;  %v459_v24 = vor.u32 %v458_v14, %v455_v8  ;;  %v468_v25 = vrot.slane %v466_v15, 4  ;;  %v474_v26 = vrot.slane %v472_v16, 5  ;;  %v1102_v29 = vshrl.u32 %v4313_v10, 16  ;;  %v3613_v8 = vld [vmem:[%s4201_s19 + $0x6c] sm:$0xe] }
  0x2f   : > { %v499_v17 = vsel %vm4290_vm5, %v494_v18, %v498_v0  ;;  %v1091_v32 = vrot.slane %v1089_v20, 4  ;;  %v1094_v33 = vrot.slane %v1092_v22, 5  ;;  %v3774_v34 = vcombine.low %v3575_v4, %v4313_v10  ;;  %v4366_v0 = vld [vmem:[%s4201_s19 + $0x20] sm:$0x1] }
  0x30   : > { %v3742_v36 = vcombine.low %v489_v28, %v499_v17  ;;  %v460_v37 = vrot.slane %v459_v24, 4  ;;  %v469_v41 = vor.u32 %v468_v25, %v464_v38  ;;  %v897_v42 = vshrl.u32 %v4320_v23, 16  ;;  %v3605_v28 = vld [vmem:[%s4201_s19 + $0xc] sm:$0xe]  ;;  %v3614_v17 = vld [vmem:[%s4201_s19 + $0x78] sm:$0xe] }
  0x31   : > { %v900_v43 = vshll.u32 %v4320_v23, 16  ;;  %v910_v44 = vshrl.u32 %v4325_v12, 16  ;;  %v3766_v46 = vcombine.low %v4320_v23, %v4325_v12  ;;  %v1076_v47 = vrot.slane %v1074_v3, 5 }
  0x32   : > { %2171 = vrot.lane.b32.xlu1 %v3742_v36, %s4151_s22  ;;  %v465_v49 = vsel %vm4290_vm5, %v460_v37, %v464_v38  ;;  %v470_v50 = vrot.slane %v469_v41, 4  ;;  %v899_v51 = vrot.slane %v897_v42, 4  ;;  %v1084_v52 = vshll.u32 %v4331_v35, 16 }
  0x33   : > { %v902_v27 = vrot.slane %v900_v43, 5  ;;  %v1077_v31 = vsel %vm4290_vm5, %v4256_v40, %v1076_v47  ;;  %v1081_v53 = vor.u32 %v4220_v13, %v1076_v47  ;;  %v884_v3 = vrot.slane %v882_v9, 5  ;;  %v3606_v47 = vld [vmem:[%s4201_s19 + $0x18] sm:$0xe] }
  0x34   : > { %v475_v54 = vsel %vm4290_vm5, %v470_v50, %v474_v26  ;;  %v1086_v55 = vrot.slane %v1084_v52, 5  ;;  %v892_v56 = vshll.u32 %v4341_v48, 16  ;;  %v1095_v58 = vor.u32 %v1094_v33, %v1091_v32 }
  0x35   : > { %v3741_v59 = vcombine.low %v465_v49, %v475_v54  ;;  %v1082_v60 = vrot.slane %v1081_v53, 4  ;;  %v885_v40 = vsel %vm4290_vm5, %v4262_v45, %v884_v3  ;;  %v889_v13 = vor.u32 %v4226_v19, %v884_v3  ;;  %v4408_v53 = vld [vmem:[%s4201_s19 + $0x7c] sm:$0xf] }
  0x36   : > { %2347 = vrot.lane.b32.xlu1 %v3774_v34, %s4149_s20  ;;  %v894_v9 = vrot.slane %v892_v56, 5  ;;  %v1096_v61 = vrot.slane %v1095_v58, 4  ;;  %v1098_v62 = vshll.u32 %v4313_v10, 16  ;;  %v1104_v63 = vrot.slane %v1102_v29, 4  ;;  %v4415_v58 = vld [vmem:[%s4201_s19 + $0x18] sm:$0xf] }
  0x37   : > { %2169 = vrot.lane.b32.xlu0 %v3741_v59, %s4151_s22  ;;  %v1087_v2 = vsel %vm4290_vm5, %v1082_v60, %v1086_v55  ;;  %v890_v38 = vrot.slane %v889_v13, 4  ;;  %v1108_v45 = vshll.u32 %v4357_v57, 16  ;;  %v903_v19 = vor.u32 %v902_v27, %v899_v51  ;;  %v4401_v51 = vld [vmem:[%s4201_s19 + $0x78] sm:$0xf] }
  0x38   : > { %v3789_v4 = vcombine.low %v1077_v31, %v1087_v2  ;;  %v1100_v39 = vrot.slane %v1098_v62, 5  ;;  %v906_v5 = vshll.u32 %v4325_v12, 16  ;;  %v912_v6 = vrot.slane %v910_v44, 4 }
  0x39   : > { %v895_v11 = vsel %vm4290_vm5, %v890_v38, %v894_v9  ;;  %v1110_v14 = vrot.slane %v1108_v45, 5  ;;  %v904_v15 = vrot.slane %v903_v19, 4  ;;  %v916_v16 = vshll.u32 %v4366_v0, 16  ;;  %v4421_v9 = vld [vmem:[%s4201_s19 + $0x1c] sm:$0xf] }
  0x3a   : > { %2425 = vrot.lane.b32.xlu1 %v3789_v4, %s4152_s23  ;;  %v3781_v18 = vcombine.low %v885_v40, %v895_v11  ;;  %v1101_v20 = vsel %vm4290_vm5, %v1096_v61, %v1100_v39  ;;  %v1105_v22 = vor.u32 %v1104_v63, %v1100_v39  ;;  %v908_v23 = vrot.slane %v906_v5, 5  ;;  %v4436_v19 = vld [vmem:[%s4201_s19 + $0x88] sm:$0xf] }
  0x3b   : > { %2331 = vrot.lane.b32.xlu0 %v3766_v46, %s4149_s20  ;;  %v918_v24 = vrot.slane %v916_v16, 5  ;;  %v3629_v25 = vrot.slane %v3613_v8, 9  ;;  %v1378_v26 = vrot.slane %v4205_v1, 5  ;;  %v1381_v29 = vrot.slane %v4331_v35, 5  ;;  %v4443_v8 = vld [vmem:[%s4201_s19 + $0x24] sm:$0xf] }
  0x3c   : > { %v1106_v32 = vrot.slane %v1105_v22, 4  ;;  %v909_v33 = vsel %vm4290_vm5, %v904_v15, %v908_v23  ;;  %v913_v34 = vor.u32 %v912_v6, %v908_v23  ;;  %v3621_v36 = vrot.slane %v3605_v28, 9  ;;  %v4452_v28 = vld [vmem:[%s4201_s19 + $0x28] sm:$0xf] }
  0x3d   : > { %v1379_v37 = vsel %vm4232_vm2, %v3629_v25, %v1378_v26  ;;  %v1380_v41 = vrot.slane %v1378_v26, 4  ;;  %v1322_v42 = vrot.slane %v4212_v7, 5  ;;  %v1325_v43 = vrot.slane %v4341_v48, 5 }
  0x3e   : > { %v1111_v1 = vsel %vm4290_vm5, %v1106_v32, %v1110_v14  ;;  %v914_v35 = vrot.slane %v913_v34, 4  ;;  %v3630_v44 = vrot.slane %v3614_v17, 9  ;;  %v1385_v46 = vrot.slane %v4313_v10, 5 }
  0x3f   : > { %2409 = vrot.lane.b32.xlu0 %v3781_v18, %s4152_s23  ;;  %v3790_v49 = vcombine.low %v1101_v20, %v1111_v1  ;;  %v1382_v50 = vsel %vm4232_vm2, %v1380_v41, %v1381_v29  ;;  %v1323_v7 = vsel %vm4232_vm2, %v3621_v36, %v1322_v42  ;;  %v1324_v48 = vrot.slane %v1322_v42, 4 }
  0x40   : > { %v919_v52 = vsel %vm4290_vm5, %v914_v35, %v918_v24  ;;  %v3805_v27 = vcombine.low %v1379_v37, %v1382_v50  ;;  %v1386_v10 = vsel %vm4232_vm2, %v3630_v44, %v1385_v46  ;;  %v1387_v31 = vrot.slane %v1385_v46, 4  ;;  %v4457_v24 = vld [vmem:[%s4201_s19 + $0x80] sm:$0x1] }
  0x41   : > { %2427 = vrot.lane.b32.xlu1 %v3790_v49, %s4152_s23  ;;  %v3782_v3 = vcombine.low %v909_v33, %v919_v52  ;;  %v1326_v54 = vsel %vm4232_vm2, %v1324_v48, %v1325_v43  ;;  %v1388_v55 = vrot.slane %v4357_v57, 5  ;;  %v3622_v56 = vrot.slane %v3606_v47, 9  ;;  %v4468_v37 = vld [vmem:[%s4201_s19 + $0x20] sm:$0x1] }
  0x42   : > { %v3797_v59 = vcombine.low %v1323_v7, %v1326_v54  ;;  %v1329_v60 = vrot.slane %v4325_v12, 5  ;;  %v1332_v40 = vrot.slane %v4366_v0, 5  ;;  %v1674_v13 = vshrl.u32 %v4401_v51, 16  ;;  %v4431_v12 = vld [vmem:[%s4201_s19 + $0x84] sm:$0xf] }
  0x43   : > { %2411 = vrot.lane.b32.xlu0 %v3782_v3, %s4152_s23  ;;  %v1389_v61 = vsel %vm4232_vm2, %v1387_v31, %v1388_v55  ;;  %v1677_v57 = vshll.u32 %v4401_v51, 16  ;;  %v1687_v62 = vshrl.u32 %v4408_v53, 16  ;;  %v3821_v63 = vcombine.low %v4401_v51, %v4408_v53 }
  0x44   : > { %v3806_v0 = vcombine.low %v1386_v10, %v1389_v61  ;;  %v1330_v2 = vsel %vm4232_vm2, %v3622_v56, %v1329_v60  ;;  %v1331_v38 = vrot.slane %v1329_v60, 4  ;;  %v1676_v45 = vrot.slane %v1674_v13, 4 }
  0x45   : > { %2505 = vrot.lane.b32.xlu1 %v3805_v27, %s4153_s24  ;;  %v1679_v4 = vrot.slane %v1677_v57, 5  ;;  %v1482_v39 = vshrl.u32 %v4415_v58, 16  ;;  %v1485_v5 = vshll.u32 %v4415_v58, 16  ;;  %v1495_v6 = vshrl.u32 %v4421_v9, 16  ;;  %v4477_v27 = vld [vmem:[%s4201_s19 + $0x8c] sm:$0x1] }
  0x46   : > { %v1333_v11 = vsel %vm4232_vm2, %v1331_v38, %v1332_v40  ;;  %v3813_v14 = vcombine.low %v4415_v58, %v4421_v9  ;;  %v1698_v15 = vshrl.u32 %v4431_v12, 16  ;;  %v1701_v16 = vshll.u32 %v4431_v12, 16  ;;  %v4487_v57 = vld [vmem:[%s4201_s19 + $0x2c] sm:$0x1] }
  0x47   : > { %2489 = vrot.lane.b32.xlu0 %v3797_v59, %s4153_s24  ;;  %v3798_v18 = vcombine.low %v1330_v2, %v1333_v11  ;;  %v1484_v20 = vrot.slane %v1482_v39, 4  ;;  %v1487_v22 = vrot.slane %v1485_v5, 5  ;;  %v1711_v23 = vshrl.u32 %v4436_v19, 16 }
  0x48   : > { %v1700_v25 = vrot.slane %v1698_v15, 4  ;;  %v1703_v26 = vrot.slane %v1701_v16, 5  ;;  %v3822_v29 = vcombine.low %v4431_v12, %v4436_v19  ;;  %v1506_v17 = vshrl.u32 %v4443_v8, 16  ;;  %v3685_v16 = vld [vmem:[%s4201_s19 + $0x18] sm:$0xe] }
  0x49   : > { %2507 = vrot.lane.b32.xlu1 %v3806_v0, %s4153_s24  ;;  %v1509_v32 = vshll.u32 %v4443_v8, 16  ;;  %v1519_v33 = vshrl.u32 %v4452_v28, 16  ;;  %v3814_v34 = vcombine.low %v4443_v8, %v4452_v28  ;;  %v1680_v36 = vor.u32 %v1679_v4, %v1676_v45  ;;  %v3693_v45 = vld [vmem:[%s4201_s19 + $0x78] sm:$0xe] }
  0x4a   : > { %v1508_v41 = vrot.slane %v1506_v17, 4  ;;  %v1683_v42 = vshll.u32 %v4408_v53, 16  ;;  %v1689_v43 = vrot.slane %v1687_v62, 4  ;;  %v1693_v1 = vshll.u32 %v4457_v24, 16 }
  0x4b   : > { %2491 = vrot.lane.b32.xlu0 %v3798_v18, %s4153_s24  ;;  %v1511_v35 = vrot.slane %v1509_v32, 5  ;;  %v1681_v44 = vrot.slane %v1680_v36, 4  ;;  %v1488_v46 = vor.u32 %v1487_v22, %v1484_v20  ;;  %v1491_v47 = vshll.u32 %v4421_v9, 16 }
  0x4c   : > { %v1685_v49 = vrot.slane %v1683_v42, 5  ;;  %v1695_v50 = vrot.slane %v1693_v1, 5  ;;  %v1497_v7 = vrot.slane %v1495_v6, 4  ;;  %v1501_v48 = vshll.u32 %v4468_v37, 16  ;;  %v4511_v42 = vld [vmem:[%s4201_s19 + $0x7c] sm:$0xf] }
  0x4d   : > { %2601 = vrot.lane.b32.xlu1 %v3821_v63, %s4154_s25  ;;  %v1489_v51 = vrot.slane %v1488_v46, 4  ;;  %v1493_v52 = vrot.slane %v1491_v47, 5  ;;  %v1704_v10 = vor.u32 %v1703_v26, %v1700_v25  ;;  %v1707_v31 = vshll.u32 %v4436_v19, 16  ;;  %v229_v25 = vld [vmem:[%s4201_s19 + $0x78] sm:$0xf] }
  0x4e   : > { %v1686_v3 = vsel %vm4290_vm5, %v1681_v44, %v1685_v49  ;;  %v1690_v54 = vor.u32 %v1689_v43, %v1685_v49  ;;  %v1503_v55 = vrot.slane %v1501_v48, 5  ;;  %v1713_v56 = vrot.slane %v1711_v23, 4  ;;  %v4522_v46 = vld [vmem:[%s4201_s19 + $0x80] sm:$0x1]  ;;  %v213_v49 = vld [vmem:[%s4201_s19 + $0x18] sm:$0xf] }
  0x4f   : > { %2585 = vrot.lane.b32.xlu0 %v3813_v14, %s4154_s25  ;;  %v1494_v58 = vsel %vm4290_vm5, %v1489_v51, %v1493_v52  ;;  %v1498_v59 = vor.u32 %v1497_v7, %v1493_v52  ;;  %v1705_v60 = vrot.slane %v1704_v10, 4  ;;  %v1709_v40 = vrot.slane %v1707_v31, 5  ;;  %v4530_v51 = vld [vmem:[%s4201_s19 + $0x1c] sm:$0xf] }
  0x50   : > { %v1691_v13 = vrot.slane %v1690_v54, 4  ;;  %v1717_v61 = vshll.u32 %v4477_v27, 16  ;;  %v1512_v62 = vor.u32 %v1511_v35, %v1508_v41  ;;  %v1515_v63 = vshll.u32 %v4452_v28, 16  ;;  %v4536_v54 = vld [vmem:[%s4201_s19 + $0x20] sm:$0x1] }
  0x51   : > { %2603 = vrot.lane.b32.xlu1 %v3822_v29, %s4154_s25  ;;  %v1499_v12 = vrot.slane %v1498_v59, 4  ;;  %v1710_v0 = vsel %vm4290_vm5, %v1705_v60, %v1709_v40  ;;  %v1714_v2 = vor.u32 %v1713_v56, %v1709_v40  ;;  %v1521_v38 = vrot.slane %v1519_v33, 4 }
  0x52   : > { %v1696_v4 = vsel %vm4290_vm5, %v1691_v13, %v1695_v50  ;;  %v1719_v39 = vrot.slane %v1717_v61, 5  ;;  %v1513_v5 = vrot.slane %v1512_v62, 4  ;;  %v1517_v6 = vrot.slane %v1515_v63, 5  ;;  %v3694_v62 = vld [vmem:[%s4201_s19 + $0x84] sm:$0xe] }
  0x53   : > { %2587 = vrot.lane.b32.xlu0 %v3814_v34, %s4154_s25  ;;  %v3837_v8 = vcombine.low %v1686_v3, %v1696_v4  ;;  %v1504_v11 = vsel %vm4290_vm5, %v1499_v12, %v1503_v55  ;;  %v1715_v14 = vrot.slane %v1714_v2, 4  ;;  %v1525_v15 = vshll.u32 %v4487_v57, 16 }
  0x54   : > { %v3829_v18 = vcombine.low %v1494_v58, %v1504_v11  ;;  %v1518_v20 = vsel %vm4290_vm5, %v1513_v5, %v1517_v6  ;;  %v1522_v22 = vor.u32 %v1521_v38, %v1517_v6  ;;  %v3709_v23 = vrot.slane %v3693_v45, 9  ;;  %v3686_v5 = vld [vmem:[%s4201_s19 + $0x24] sm:$0xe] }
  0x55   : > { %2681 = vrot.lane.b32.xlu1 %v3837_v8, %s4155_s26  ;;  %v1720_v26 = vsel %vm4290_vm5, %v1715_v14, %v1719_v39  ;;  %v1527_v29 = vrot.slane %v1525_v15, 5  ;;  %v1987_v17 = vrot.slane %v4408_v53, 5  ;;  %v1990_v32 = vrot.slane %v4457_v24, 5 }
  0x56   : > { %v3838_v33 = vcombine.low %v1710_v0, %v1720_v26  ;;  %v1523_v34 = vrot.slane %v1522_v22, 4  ;;  %v3701_v36 = vrot.slane %v3685_v16, 9  ;;  %v1931_v41 = vrot.slane %v4421_v9, 5  ;;  %v231_v22 = vld [vmem:[%s4201_s19 + $0x84] sm:$0xf] }
  0x57   : > { %2665 = vrot.lane.b32.xlu0 %v3829_v18, %s4155_s26  ;;  %v1988_v43 = vsel %vm4232_vm2, %v3709_v23, %v1987_v17  ;;  %v1989_v1 = vrot.slane %v1987_v17, 4  ;;  %v1934_v35 = vrot.slane %v4468_v37, 5  ;;  %v501_v53 = vshrl.u32 %v229_v25, 16 }
  0x58   : > { %v1528_v24 = vsel %vm4290_vm5, %v1523_v34, %v1527_v29  ;;  %v1932_v44 = vsel %vm4232_vm2, %v3701_v36, %v1931_v41  ;;  %v1933_v9 = vrot.slane %v1931_v41, 4  ;;  %v504_v47 = vshll.u32 %v229_v25, 16  ;;  %v4559_v34 = vld [vmem:[%s4201_s19 + $0x88] sm:$0xf] }
  0x59   : > { %2683 = vrot.lane.b32.xlu1 %v3838_v33, %s4155_s26  ;;  %v3830_v50 = vcombine.low %v1518_v20, %v1528_v24  ;;  %v1991_v7 = vsel %vm4232_vm2, %v1989_v1, %v1990_v32  ;;  %v503_v37 = vrot.slane %v501_v53, 4  ;;  %v510_v48 = vshll.u32 %v4511_v42, 16  ;;  %v215_v24 = vld [vmem:[%s4201_s19 + $0x24] sm:$0xf] }
  0x5a   : > { %v3853_v52 = vcombine.low %v1988_v43, %v1991_v7  ;;  %v1935_v10 = vsel %vm4232_vm2, %v1933_v9, %v1934_v35  ;;  %v506_v31 = vrot.slane %v504_v47, 5  ;;  %v514_v3 = vshrl.u32 %v4511_v42, 16  ;;  %v4564_v43 = vld [vmem:[%s4201_s19 + $0x8c] sm:$0x1] }
  0x5b   : > { %2667 = vrot.lane.b32.xlu0 %v3830_v50, %s4155_s26  ;;  %v3845_v55 = vcombine.low %v1932_v44, %v1935_v10  ;;  %v512_v56 = vrot.slane %v510_v48, 5  ;;  %v520_v58 = vshll.u32 %v4522_v46, 16  ;;  %v309_v59 = vshrl.u32 %v213_v49, 16  ;;  %v4576_v50 = vld [vmem:[%s4201_s19 + $0x28] sm:$0xf] }
  0x5c   : > { %v507_v60 = vor.u32 %v506_v31, %v503_v37  ;;  %v516_v40 = vrot.slane %v514_v3, 4  ;;  %v312_v13 = vshll.u32 %v213_v49, 16  ;;  %v318_v61 = vshll.u32 %v4530_v51, 16  ;;  %v4583_v10 = vld [vmem:[%s4201_s19 + $0x2c] sm:$0x1] }
  0x5d   : > { %2761 = vrot.lane.b32.xlu1 %v3853_v52, %s4156_s27  ;;  %v522_v63 = vrot.slane %v520_v58, 5  ;;  %v311_v12 = vrot.slane %v309_v59, 4  ;;  %v322_v0 = vshrl.u32 %v4530_v51, 16  ;;  %v328_v2 = vshll.u32 %v4536_v54, 16  ;;  %v654_v58 = vld [vmem:[%s4201_s19 + $0x78] sm:$0xe] }
  0x5e   : > { %v508_v38 = vrot.slane %v507_v60, 4  ;;  %v517_v45 = vor.u32 %v516_v40, %v512_v56  ;;  %v314_v4 = vrot.slane %v312_v13, 5  ;;  %v320_v39 = vrot.slane %v318_v61, 5  ;;  %v4070_v59 = vld [vmem:[%s6126_s1] sm:$0xff]  }
  0x5f   : > { %2745 = vrot.lane.b32.xlu0 %v3845_v55, %s4156_s27  ;;  %v324_v6 = vrot.slane %v322_v0, 4  ;;  %v330_v8 = vrot.slane %v328_v2, 5  ;;  %v3710_v11 = vrot.slane %v3694_v62, 9  ;;  %v1994_v14 = vrot.slane %v4436_v19, 5  ;;  %v646_v2 = vld [vmem:[%s4201_s19 + $0x18] sm:$0xe]  ;;  %3967 = vmatprep.subr.bf16.mxu0 %v4070_v59 }
  0x60   : > { %v513_v15 = vsel %vm4290_vm5, %v508_v38, %v512_v56  ;;  %v518_v16 = vrot.slane %v517_v45, 4  ;;  %v315_v18 = vor.u32 %v314_v4, %v311_v12  ;;  %v1997_v20 = vrot.slane %v4477_v27, 5  ;;  %4005 = vmatprep.subr.bf16.mxu1 %v4070_v59  ;;  %3968 = vmatpush3.bf16.msra.mxu0 %v4070_v59 }
  0x61   : > { %v325_v23 = vor.u32 %v324_v6, %v320_v39  ;;  %v1995_v25 = vsel %vm4232_vm2, %v3710_v11, %v1994_v14  ;;  %v1996_v26 = vrot.slane %v1994_v14, 4  ;;  %v3702_v29 = vrot.slane %v3686_v5, 9  ;;  %v4073_v5 = vld [vmem:[%s6126_s1 + $0x8] sm:$0xff]   ;;  %4008 = vmatpush3.bf16.msra.mxu1 %v4070_v59 }
  0x62   : > { %v523_v17 = vsel %vm4290_vm5, %v518_v16, %v522_v63  ;;  %v316_v19 = vrot.slane %v315_v18, 4  ;;  %v1938_v32 = vrot.slane %v4452_v28, 5  ;;  %v1941_v33 = vrot.slane %v4487_v57, 5  ;;  %3969 = vmatprep.subr.bf16.mxu0 %v4073_v5  ;;  %4006 = vmatprep.subr.bf16.mxu1 %v4073_v5 }
  0x63   : > { %v3743_v27 = vcombine.low %v513_v15, %v523_v17  ;;  %v326_v36 = vrot.slane %v325_v23, 4  ;;  %v1998_v41 = vsel %vm4232_vm2, %v1996_v26, %v1997_v20  ;;  %v525_v1 = vshrl.u32 %v231_v22, 16 }
  0x64   : > { %v321_v35 = vsel %vm4290_vm5, %v316_v19, %v320_v39  ;;  %v3854_v53 = vcombine.low %v1995_v25, %v1998_v41  ;;  %v1939_v28 = vsel %vm4232_vm2, %v3702_v29, %v1938_v32  ;;  %v1940_v57 = vrot.slane %v1938_v32, 4  ;;  %v647_v32 = vld [vmem:[%s4201_s19 + $0x24] sm:$0xe]  ;;  %3970 = vmatpush3.bf16.msra.mxu0 %v4073_v5 }
  0x65   : > { %2173 = vrot.lane.b32.xlu1 %v3743_v27, %s4151_s22  ;;  %v331_v44 = vsel %vm4290_vm5, %v326_v36, %v330_v8  ;;  %v527_v9 = vrot.slane %v525_v1, 4  ;;  %v528_v47 = vshll.u32 %v231_v22, 16  ;;  %v534_v49 = vshll.u32 %v4559_v34, 16  ;;  %v655_v22 = vld [vmem:[%s4201_s19 + $0x84] sm:$0xe]  ;;  %4009 = vmatpush3.bf16.msra.mxu1 %v4073_v5 }
  0x66   : > { %v3735_v7 = vcombine.low %v321_v35, %v331_v44  ;;  %v1942_v37 = vsel %vm4232_vm2, %v1940_v57, %v1941_v33  ;;  %v538_v48 = vshrl.u32 %v4559_v34, 16  ;;  %v544_v52 = vshll.u32 %v4564_v43, 16 }
  0x67   : > { %v3846_v31 = vcombine.low %v1939_v28, %v1942_v37  ;;  %v530_v3 = vrot.slane %v528_v47, 5  ;;  %v536_v55 = vrot.slane %v534_v49, 5  ;;  %v333_v56 = vshrl.u32 %v215_v24, 16 }
  0x68   : > { %2157 = vrot.lane.b32.xlu0 %v3735_v7, %s4151_s22  ;;  %v540_v60 = vrot.slane %v538_v48, 4  ;;  %v546_v40 = vrot.slane %v544_v52, 5  ;;  %v336_v13 = vshll.u32 %v215_v24, 16  ;;  %v342_v61 = vshll.u32 %v4576_v50, 16  ;;  %v4633_v48 = vld [vmem:[%s4201_s19 + $0x24] sm:$0xf] }
  0x69   : > { %2763 = vrot.lane.b32.xlu1 %v3854_v53, %s4156_s27  ;;  %v531_v62 = vor.u32 %v530_v3, %v527_v9  ;;  %v335_v63 = vrot.slane %v333_v56, 4  ;;  %v346_v12 = vshrl.u32 %v4576_v50, 16  ;;  %v352_v0 = vshll.u32 %v4583_v10, 16  ;;  %v4626_v9 = vld [vmem:[%s4201_s19 + $0x88] sm:$0xf] }
  0x6a   : > { %v541_v38 = vor.u32 %v540_v60, %v536_v55  ;;  %v338_v45 = vrot.slane %v336_v13, 5  ;;  %v344_v4 = vrot.slane %v342_v61, 5  ;;  %v3551_v39 = vrot.slane %v654_v58, 9  ;;  %v4644_v56 = vld [vmem:[%s4201_s19 + $0x28] sm:$0xf] }
  0x6b   : > { %v532_v6 = vrot.slane %v531_v62, 4  ;;  %v348_v8 = vrot.slane %v346_v12, 4  ;;  %v354_v11 = vrot.slane %v352_v0, 5  ;;  %v783_v14 = vrot.slane %v4511_v42, 5  ;;  %v3579_v13 = vld [vmem:[%s4201_s19 + $0x90] sm:$0xf] }
  0x6c   : > { %2747 = vrot.lane.b32.xlu0 %v3846_v31, %s4156_s27  ;;  %v542_v15 = vrot.slane %v541_v38, 4  ;;  %v339_v16 = vor.u32 %v338_v45, %v335_v63  ;;  %v786_v18 = vrot.slane %v4522_v46, 5  ;;  %v3543_v20 = vrot.slane %v646_v2, 9  ;;  %v4654_v61 = vld [vmem:[%s4201_s19 + $0x94] sm:$0xf] }
  0x6d   : > { %v537_v23 = vsel %vm4290_vm5, %v532_v6, %v536_v55  ;;  %v349_v25 = vor.u32 %v348_v8, %v344_v4  ;;  %v784_v26 = vsel %vm4232_vm2, %v3551_v39, %v783_v14  ;;  %v785_v29 = vrot.slane %v783_v14, 4  ;;  %v4660_v2 = vld [vmem:[%s4201_s19 + $0x30] sm:$0xf]  ;;  %v4663_v38 = vld [vmem:[%s4201_s19 + $0x34] sm:$0xf] }
  0x6e   : > { %v547_v42 = vsel %vm4290_vm5, %v542_v15, %v546_v40  ;;  %v340_v17 = vrot.slane %v339_v16, 4  ;;  %v727_v19 = vrot.slane %v4530_v51, 5  ;;  %v730_v46 = vrot.slane %v4536_v54, 5  ;;  %v4618_v54 = vld [vmem:[%s4201_s19 + $0x84] sm:$0xf] }
  0x6f   : > { %v3744_v33 = vcombine.low %v537_v23, %v547_v42  ;;  %v350_v27 = vrot.slane %v349_v25, 4  ;;  %v787_v36 = vsel %vm4232_vm2, %v785_v29, %v786_v18  ;;  %v3552_v41 = vrot.slane %v655_v22, 9  ;;  %v4676_v22 = vld [vmem:[%s4201_s19 + $0x8c] sm:$0x1] }
  0x70   : > { %v345_v1 = vsel %vm4290_vm5, %v340_v17, %v344_v4  ;;  %v3759_v35 = vcombine.low %v784_v26, %v787_v36  ;;  %v728_v51 = vsel %vm4232_vm2, %v3543_v20, %v727_v19  ;;  %v729_v53 = vrot.slane %v727_v19, 4  ;;  %v4681_v42 = vld [vmem:[%s4201_s19 + $0x2c] sm:$0x1] }
  0x71   : > { %2175 = vrot.lane.b32.xlu1 %v3744_v33, %s4151_s22  ;;  %v355_v28 = vsel %vm4290_vm5, %v350_v27, %v354_v11  ;;  %v790_v57 = vrot.slane %v4559_v34, 5  ;;  %v793_v24 = vrot.slane %v4564_v43, 5  ;;  %v3544_v44 = vrot.slane %v647_v32, 9 }
  0x72   : > { %v3736_v47 = vcombine.low %v345_v1, %v355_v28  ;;  %v731_v49 = vsel %vm4232_vm2, %v729_v53, %v730_v46  ;;  %v734_v7 = vrot.slane %v4576_v50, 5  ;;  %v737_v37 = vrot.slane %v4583_v10, 5 }
  0x73   : > { %v3751_v52 = vcombine.low %v728_v51, %v731_v49  ;;  %v791_v34 = vsel %vm4232_vm2, %v3552_v41, %v790_v57  ;;  %v792_v43 = vrot.slane %v790_v57, 4  ;;  %v1113_v31 = vshrl.u32 %v4618_v54, 16 }
  0x74   : > { %2159 = vrot.lane.b32.xlu0 %v3736_v47, %s4151_s22  ;;  %v735_v3 = vsel %vm4232_vm2, %v3544_v44, %v734_v7  ;;  %v736_v50 = vrot.slane %v734_v7, 4  ;;  %v1116_v10 = vshll.u32 %v4618_v54, 16  ;;  %v1126_v55 = vshrl.u32 %v4626_v9, 16 }
  0x75   : > { %2253 = vrot.lane.b32.xlu1 %v3759_v35, %s4150_s21  ;;  %v794_v58 = vsel %vm4232_vm2, %v792_v43, %v793_v24  ;;  %v1115_v59 = vrot.slane %v1113_v31, 4  ;;  %v3775_v60 = vcombine.low %v4618_v54, %v4626_v9  ;;  %v921_v40 = vshrl.u32 %v4633_v48, 16  ;;  %v4690_v24 = vld [vmem:[%s4201_s19 + $0x98] sm:$0x1] }
  0x76   : > { %v3760_v62 = vcombine.low %v791_v34, %v794_v58  ;;  %v738_v63 = vsel %vm4232_vm2, %v736_v50, %v737_v37  ;;  %v1118_v12 = vrot.slane %v1116_v10, 5  ;;  %v924_v0 = vshll.u32 %v4633_v48, 16  ;;  %v4701_v50 = vld [vmem:[%s4201_s19 + $0x38] sm:$0x1] }
  0x77   : > { %v3752_v45 = vcombine.low %v735_v3, %v738_v63  ;;  %v923_v4 = vrot.slane %v921_v40, 4  ;;  %v934_v39 = vshrl.u32 %v4644_v56, 16  ;;  %v3767_v5 = vcombine.low %v4633_v48, %v4644_v56 }
  0x78   : > { %2237 = vrot.lane.b32.xlu0 %v3751_v52, %s4150_s21  ;;  %v926_v6 = vrot.slane %v924_v0, 5  ;;  %v1137_v8 = vshrl.u32 %v3579_v13, 16  ;;  %v1140_v11 = vshll.u32 %v3579_v13, 16  ;;  %v1150_v14 = vshrl.u32 %v4654_v61, 16 }
  0x79   : > { %2255 = vrot.lane.b32.xlu1 %v3760_v62, %s4150_s21  ;;  %v3776_v15 = vcombine.low %v3579_v13, %v4654_v61  ;;  %v945_v16 = vshrl.u32 %v4660_v2, 16  ;;  %v948_v18 = vshll.u32 %v4660_v2, 16  ;;  %v958_v20 = vshrl.u32 %v4663_v38, 16  ;;  %v3615_v13 = vld [vmem:[%s4201_s19 + $0x84] sm:$0xe] }
  0x7a   : > { %v1139_v23 = vrot.slane %v1137_v8, 4  ;;  %v1142_v25 = vrot.slane %v1140_v11, 5  ;;  %v3768_v26 = vcombine.low %v4660_v2, %v4663_v38  ;;  %v1119_v29 = vor.u32 %v1118_v12, %v1115_v59 }
  0x7b   : > { %v947_v17 = vrot.slane %v945_v16, 4  ;;  %v950_v19 = vrot.slane %v948_v18, 5  ;;  %v1122_v46 = vshll.u32 %v4626_v9, 16  ;;  %v1128_v32 = vrot.slane %v1126_v55, 4 }
  0x7c   : > { %2239 = vrot.lane.b32.xlu0 %v3752_v45, %s4150_s21  ;;  %v1120_v33 = vrot.slane %v1119_v29, 4  ;;  %v1132_v27 = vshll.u32 %v4676_v22, 16  ;;  %v927_v36 = vor.u32 %v926_v6, %v923_v4  ;;  %v930_v41 = vshll.u32 %v4644_v56, 16 }
  0x7d   : > { %2349 = vrot.lane.b32.xlu1 %v3775_v60, %s4149_s20  ;;  %v1124_v1 = vrot.slane %v1122_v46, 5  ;;  %v936_v35 = vrot.slane %v934_v39, 4  ;;  %v940_v51 = vshll.u32 %v4681_v42, 16  ;;  %v1143_v53 = vor.u32 %v1142_v25, %v1139_v23 }
  0x7e   : > { %v1134_v54 = vrot.slane %v1132_v27, 5  ;;  %v928_v28 = vrot.slane %v927_v36, 4  ;;  %v932_v57 = vrot.slane %v930_v41, 5  ;;  %v1146_v44 = vshll.u32 %v4654_v61, 16  ;;  %v4734_v41 = vld [vmem:[%s4201_s19 + $0x90] sm:$0xf] }
  0x7f   : > { %v1125_v47 = vsel %vm4290_vm5, %v1120_v33, %v1124_v1  ;;  %v1129_v49 = vor.u32 %v1128_v32, %v1124_v1  ;;  %v942_v7 = vrot.slane %v940_v51, 5  ;;  %v1144_v37 = vrot.slane %v1143_v53, 4  ;;  %v4741_v53 = vld [vmem:[%s4201_s19 + $0x94] sm:$0xf] }
  0x80   : > { %2333 = vrot.lane.b32.xlu0 %v3767_v5, %s4149_s20  ;;  %v933_v48 = vsel %vm4290_vm5, %v928_v28, %v932_v57  ;;  %v937_v52 = vor.u32 %v936_v35, %v932_v57  ;;  %v1148_v34 = vrot.slane %v1146_v44, 5  ;;  %v1152_v43 = vrot.slane %v1150_v14, 4  ;;  %v3607_v5 = vld [vmem:[%s4201_s19 + $0x24] sm:$0xe]  ;;  %v4748_v44 = vld [vmem:[%s4201_s19 + $0x30] sm:$0xf] }
  0x81   : > { %2351 = vrot.lane.b32.xlu1 %v3776_v15, %s4149_s20  ;;  %v1130_v31 = vrot.slane %v1129_v49, 4  ;;  %v1156_v3 = vshll.u32 %v4690_v24, 16  ;;  %v951_v10 = vor.u32 %v950_v19, %v947_v17  ;;  %v954_v55 = vshll.u32 %v4663_v38, 16  ;;  %v3616_v15 = vld [vmem:[%s4201_s19 + $0x90] sm:$0xe] }
  0x82   : > { %v938_v58 = vrot.slane %v937_v52, 4  ;;  %v1149_v59 = vsel %vm4290_vm5, %v1144_v37, %v1148_v34  ;;  %v1153_v60 = vor.u32 %v1152_v43, %v1148_v34  ;;  %v960_v40 = vrot.slane %v958_v20, 4  ;;  %v3608_v19 = vld [vmem:[%s4201_s19 + $0x30] sm:$0xe]  ;;  %v4755_v37 = vld [vmem:[%s4201_s19 + $0x34] sm:$0xf] }
  0x83   : > { %v1135_v62 = vsel %vm4290_vm5, %v1130_v31, %v1134_v54  ;;  %v1158_v63 = vrot.slane %v1156_v3, 5  ;;  %v952_v12 = vrot.slane %v951_v10, 4  ;;  %v956_v0 = vrot.slane %v954_v55, 5 }
  0x84   : > { %2335 = vrot.lane.b32.xlu0 %v3768_v26, %s4149_s20  ;;  %v3791_v2 = vcombine.low %v1125_v47, %v1135_v62  ;;  %v943_v45 = vsel %vm4290_vm5, %v938_v58, %v942_v7  ;;  %v1154_v4 = vrot.slane %v1153_v60, 4  ;;  %v964_v39 = vshll.u32 %v4701_v50, 16  ;;  %v4772_v58 = vld [vmem:[%s4201_s19 + $0xa0] sm:$0xf]  ;;  %v4778_v62 = vld [vmem:[%s4201_s19 + $0x3c] sm:$0xf] }
  0x85   : > { %v3783_v6 = vcombine.low %v933_v48, %v943_v45  ;;  %v957_v8 = vsel %vm4290_vm5, %v952_v12, %v956_v0  ;;  %v961_v11 = vor.u32 %v960_v40, %v956_v0  ;;  %v3631_v14 = vrot.slane %v3615_v13, 9  ;;  %v4788_v45 = vld [vmem:[%s4201_s19 + $0x40] sm:$0xf] }
  0x86   : > { %2429 = vrot.lane.b32.xlu1 %v3791_v2, %s4152_s23  ;;  %v1159_v16 = vsel %vm4290_vm5, %v1154_v4, %v1158_v63  ;;  %v966_v18 = vrot.slane %v964_v39, 5  ;;  %v1392_v20 = vrot.slane %v4626_v9, 5  ;;  %v1395_v23 = vrot.slane %v4676_v22, 5 }
  0x87   : > { %v3792_v25 = vcombine.low %v1149_v59, %v1159_v16  ;;  %v962_v26 = vrot.slane %v961_v11, 4  ;;  %v3623_v29 = vrot.slane %v3607_v5, 9  ;;  %v1336_v17 = vrot.slane %v4644_v56, 5  ;;  %v4757_v48 = vpop.permute.xlu1 %2345 }
  0x88   : > { %2413 = vrot.lane.b32.xlu0 %v3783_v6, %s4152_s23  ;;  %v1393_v46 = vsel %vm4232_vm2, %v3631_v14, %v1392_v20  ;;  %v1394_v32 = vrot.slane %v1392_v20, 4  ;;  %v1339_v33 = vrot.slane %v4681_v42, 5  ;;  %v3632_v27 = vrot.slane %v3616_v15, 9 }
  0x89   : > { %v967_v9 = vsel %vm4290_vm5, %v962_v26, %v966_v18  ;;  %v1337_v22 = vsel %vm4232_vm2, %v3623_v29, %v1336_v17  ;;  %v1338_v36 = vrot.slane %v1336_v17, 4  ;;  %v1399_v56 = vrot.slane %v4654_v61, 5  ;;  %v4794_v11 = vpop.permute.xlu0 %2329  ;;  %v4807_v17 = vld [vmem:[%s4201_s19 + $0x38] sm:$0x1] }
  0x8a   : > { %2431 = vrot.lane.b32.xlu1 %v3792_v25, %s4152_s23  ;;  %v3784_v1 = vcombine.low %v957_v8, %v967_v9  ;;  %v1396_v42 = vsel %vm4232_vm2, %v1394_v32, %v1395_v23  ;;  %v1402_v35 = vrot.slane %v4690_v24, 5  ;;  %v3624_v51 = vrot.slane %v3608_v19, 9  ;;  %v4792_v8 = vld [vmem:[%s4201_s19 + $0x98] sm:$0x1] }
  0x8b   : > { %v3807_v54 = vcombine.low %v1393_v46, %v1396_v42  ;;  %v1340_v28 = vsel %vm4232_vm2, %v1338_v36, %v1339_v33  ;;  %v1400_v61 = vsel %vm4232_vm2, %v3632_v27, %v1399_v56  ;;  %v1401_v57 = vrot.slane %v1399_v56, 4 }
  0x8c   : > { %2415 = vrot.lane.b32.xlu0 %v3784_v1, %s4152_s23  ;;  %v3799_v47 = vcombine.low %v1337_v22, %v1340_v28  ;;  %v1343_v24 = vrot.slane %v4663_v38, 5  ;;  %v1346_v49 = vrot.slane %v4701_v50, 5  ;;  %v1722_v7 = vshrl.u32 %v4734_v41, 16  ;;  %v4766_v38 = vld [vmem:[%s4201_s19 + $0x9c] sm:$0xf] }
  0x8d   : > { %v1403_v52 = vsel %vm4232_vm2, %v1401_v57, %v1402_v35  ;;  %v1725_v34 = vshll.u32 %v4734_v41, 16  ;;  %v1735_v43 = vshrl.u32 %v4741_v53, 16  ;;  %v3823_v31 = vcombine.low %v4734_v41, %v4741_v53 }
  0x8e   : > { %2509 = vrot.lane.b32.xlu1 %v3807_v54, %s4153_s24  ;;  %v3808_v3 = vcombine.low %v1400_v61, %v1403_v52  ;;  %v1344_v50 = vsel %vm4232_vm2, %v3624_v51, %v1343_v24  ;;  %v1345_v10 = vrot.slane %v1343_v24, 4  ;;  %v1724_v55 = vrot.slane %v1722_v7, 4  ;;  %v4816_v54 = vld [vmem:[%s4201_s19 + $0xa4] sm:$0x1] }
  0x8f   : > { %v1727_v59 = vrot.slane %v1725_v34, 5  ;;  %v1530_v60 = vshrl.u32 %v4748_v44, 16  ;;  %v1533_v40 = vshll.u32 %v4748_v44, 16  ;;  %v1543_v13 = vshrl.u32 %v4755_v37, 16  ;;  %v4800_v20 = vpop.permute.xlu1 %2249 }
  0x90   : > { %2493 = vrot.lane.b32.xlu0 %v3799_v47, %s4153_s24  ;;  %v1347_v63 = vsel %vm4232_vm2, %v1345_v10, %v1346_v49  ;;  %v3815_v12 = vcombine.low %v4748_v44, %v4755_v37  ;;  %v1746_v0 = vshrl.u32 %v4766_v38, 16  ;;  %v1749_v2 = vshll.u32 %v4766_v38, 16 }
  0x91   : > { %v3800_v4 = vcombine.low %v1344_v50, %v1347_v63  ;;  %v1532_v39 = vrot.slane %v1530_v60, 4  ;;  %v1535_v5 = vrot.slane %v1533_v40, 5  ;;  %v1759_v6 = vshrl.u32 %v4772_v58, 16  ;;  %v4819_v57 = vpop.permute.xlu0 %2233  ;;  %v4831_v50 = vld [vmem:[%s4201_s19 + $0x44] sm:$0x1] }
  0x92   : > { %2511 = vrot.lane.b32.xlu1 %v3808_v3, %s4153_s24  ;;  %v1748_v14 = vrot.slane %v1746_v0, 4  ;;  %v1751_v15 = vrot.slane %v1749_v2, 5  ;;  %v3824_v16 = vcombine.low %v4766_v38, %v4772_v58  ;;  %v1554_v18 = vshrl.u32 %v4778_v62, 16 }
  0x93   : > { %v1557_v23 = vshll.u32 %v4778_v62, 16  ;;  %v1567_v25 = vshrl.u32 %v4788_v45, 16  ;;  %v3816_v26 = vcombine.low %v4778_v62, %v4788_v45  ;;  %v1728_v29 = vor.u32 %v1727_v59, %v1724_v55  ;;  %v4824_v7 = vpop.permute.xlu1 %2251  ;;  %v3695_v62 = vld [vmem:[%s4201_s19 + $0x90] sm:$0xe] }
  0x94   : > { %2495 = vrot.lane.b32.xlu0 %v3800_v4, %s4153_s24  ;;  %v1556_v19 = vrot.slane %v1554_v18, 4  ;;  %v1731_v46 = vshll.u32 %v4741_v53, 16  ;;  %v1737_v32 = vrot.slane %v1735_v43, 4  ;;  %v1741_v33 = vshll.u32 %v4792_v8, 16 }
  0x95   : > { %v1559_v27 = vrot.slane %v1557_v23, 5  ;;  %v1729_v9 = vrot.slane %v1728_v29, 4  ;;  %v1536_v22 = vor.u32 %v1535_v5, %v1532_v39  ;;  %v1539_v36 = vshll.u32 %v4755_v37, 16 }
  0x96   : > { %2605 = vrot.lane.b32.xlu1 %v3823_v31, %s4154_s25  ;;  %v1733_v56 = vrot.slane %v1731_v46, 5  ;;  %v1743_v41 = vrot.slane %v1741_v33, 5  ;;  %v1545_v1 = vrot.slane %v1543_v13, 4  ;;  %v1549_v42 = vshll.u32 %v4807_v17, 16 }
  0x97   : > { %v1537_v35 = vrot.slane %v1536_v22, 4  ;;  %v1541_v51 = vrot.slane %v1539_v36, 5  ;;  %v1752_v28 = vor.u32 %v1751_v15, %v1748_v14  ;;  %v1755_v61 = vshll.u32 %v4772_v58, 16  ;;  %v3687_v14 = vld [vmem:[%s4201_s19 + $0x30] sm:$0xe]  ;;  %v4844_v15 = vpop.permute.xlu0 %2235 }
  0x98   : > { %2589 = vrot.lane.b32.xlu0 %v3815_v12, %s4154_s25  ;;  %v1734_v44 = vsel %vm4290_vm5, %v1729_v9, %v1733_v56  ;;  %v1738_v47 = vor.u32 %v1737_v32, %v1733_v56  ;;  %v1551_v24 = vrot.slane %v1549_v42, 5  ;;  %v1761_v49 = vrot.slane %v1759_v6, 4  ;;  %v4859_v56 = vld [vmem:[%s4201_s19 + $0x94] sm:$0xf] }
  0x99   : > { %v1542_v52 = vsel %vm4290_vm5, %v1537_v35, %v1541_v51  ;;  %v1546_v34 = vor.u32 %v1545_v1, %v1541_v51  ;;  %v1753_v43 = vrot.slane %v1752_v28, 4  ;;  %v1757_v31 = vrot.slane %v1755_v61, 5  ;;  %v4869_v28 = vld [vmem:[%s4201_s19 + $0x98] sm:$0x1]  ;;  %v217_v61 = vld [vmem:[%s4201_s19 + $0x30] sm:$0xf] }
  0x9a   : > { %2607 = vrot.lane.b32.xlu1 %v3824_v16, %s4154_s25  ;;  %v1739_v38 = vrot.slane %v1738_v47, 4  ;;  %v1765_v3 = vshll.u32 %v4816_v54, 16  ;;  %v1560_v10 = vor.u32 %v1559_v27, %v1556_v19  ;;  %v1563_v55 = vshll.u32 %v4788_v45, 16 }
  0x9b   : > { %v1547_v59 = vrot.slane %v1546_v34, 4  ;;  %v1758_v60 = vsel %vm4290_vm5, %v1753_v43, %v1757_v31  ;;  %v1762_v40 = vor.u32 %v1761_v49, %v1757_v31  ;;  %v1569_v13 = vrot.slane %v1567_v25, 4  ;;  %v4877_v49 = vld [vmem:[%s4201_s19 + $0x34] sm:$0xf] }
  0x9c   : > { %2591 = vrot.lane.b32.xlu0 %v3816_v26, %s4154_s25  ;;  %v1744_v63 = vsel %vm4290_vm5, %v1739_v38, %v1743_v41  ;;  %v1767_v12 = vrot.slane %v1765_v3, 5  ;;  %v1561_v0 = vrot.slane %v1560_v10, 4  ;;  %v1565_v2 = vrot.slane %v1563_v55, 5  ;;  %v233_v26 = vld [vmem:[%s4201_s19 + $0x90] sm:$0xf]  ;;  %v4849_v29 = vpop.permute.xlu1 %2155 }
  0x9d   : > { %v3839_v4 = vcombine.low %v1734_v44, %v1744_v63  ;;  %v1552_v39 = vsel %vm4290_vm5, %v1547_v59, %v1551_v24  ;;  %v1763_v5 = vrot.slane %v1762_v40, 4  ;;  %v1573_v6 = vshll.u32 %v4831_v50, 16  ;;  %v4883_v3 = vld [vmem:[%s4201_s19 + $0x38] sm:$0x1] }
  0x9e   : > { %v3831_v16 = vcombine.low %v1542_v52, %v1552_v39  ;;  %v1566_v18 = vsel %vm4290_vm5, %v1561_v0, %v1565_v2  ;;  %v1570_v23 = vor.u32 %v1569_v13, %v1565_v2  ;;  %v3711_v25 = vrot.slane %v3695_v62, 9 }
  0x9f   : > { %2685 = vrot.lane.b32.xlu1 %v3839_v4, %s4155_s26  ;;  %v1768_v19 = vsel %vm4290_vm5, %v1763_v5, %v1767_v12  ;;  %v1575_v46 = vrot.slane %v1573_v6, 5  ;;  %v2001_v32 = vrot.slane %v4741_v53, 5  ;;  %v2004_v33 = vrot.slane %v4792_v8, 5 }
  0xa0   : > { %2669 = vrot.lane.b32.xlu0 %v3831_v16, %s4155_s26  ;;  %v3840_v27 = vcombine.low %v1758_v60, %v1768_v19  ;;  %v1571_v9 = vrot.slane %v1570_v23, 4  ;;  %v3703_v22 = vrot.slane %v3687_v14, 9  ;;  %v1945_v36 = vrot.slane %v4755_v37, 5  ;;  %v2154_v52 = vpop.permute.xlu0 %2153 }
  0xa1   : > { %v2002_v41 = vsel %vm4232_vm2, %v3711_v25, %v2001_v32  ;;  %v2003_v1 = vrot.slane %v2001_v32, 4  ;;  %v1948_v42 = vrot.slane %v4807_v17, 5  ;;  %v549_v53 = vshrl.u32 %v233_v26, 16 }
  0xa2   : > { %v1576_v8 = vsel %vm4290_vm5, %v1571_v9, %v1575_v46  ;;  %v1946_v35 = vsel %vm4232_vm2, %v3703_v22, %v1945_v36  ;;  %v1947_v51 = vrot.slane %v1945_v36, 4  ;;  %v552_v37 = vshll.u32 %v233_v26, 16 }
  0xa3   : > { %2687 = vrot.lane.b32.xlu1 %v3840_v27, %s4155_s26  ;;  %v3832_v44 = vcombine.low %v1566_v18, %v1576_v8  ;;  %v2005_v47 = vsel %vm4232_vm2, %v2003_v1, %v2004_v33  ;;  %v551_v17 = vrot.slane %v549_v53, 4  ;;  %v558_v24 = vshll.u32 %v4859_v56, 16  ;;  %v3696_v18 = vld [vmem:[%s4201_s19 + $0x9c] sm:$0xe]  ;;  %v4097_v33 = vld [vmem:[%s4201_s19 + $0x4] sm:$0xf] }
  0xa4   : > { %v3855_v34 = vcombine.low %v2002_v41, %v2005_v47  ;;  %v1949_v43 = vsel %vm4232_vm2, %v1947_v51, %v1948_v42  ;;  %v554_v31 = vrot.slane %v552_v37, 5  ;;  %v562_v38 = vshrl.u32 %v4859_v56, 16  ;;  %v4885_v10 = vpop.permute.xlu1 %2171  ;;  %v4098_v27 = vld [vmem:[%s4201_s19] sm:$0xf]  ;;  %v4099_v41 = vld [vmem:[%s4201_s19 + $0x10] sm:$0xf] }
  0xa5   : > { %2671 = vrot.lane.b32.xlu0 %v3832_v44, %s4155_s26  ;;  %v3847_v55 = vcombine.low %v1946_v35, %v1949_v43  ;;  %v560_v59 = vrot.slane %v558_v24, 5  ;;  %v568_v60 = vshll.u32 %v4869_v28, 16  ;;  %v357_v40 = vshrl.u32 %v217_v61, 16  ;;  %v4100_v1 = vld [vmem:[%s4201_s19 + $0xc] sm:$0xf] }
  0xa6   : > { %v555_v13 = vor.u32 %v554_v31, %v551_v17  ;;  %v564_v62 = vrot.slane %v562_v38, 4  ;;  %v360_v63 = vshll.u32 %v217_v61, 16  ;;  %v366_v12 = vshll.u32 %v4877_v49, 16  ;;  %v3688_v8 = vld [vmem:[%s4201_s19 + $0x3c] sm:$0xe] }
  0xa7   : > { %2765 = vrot.lane.b32.xlu1 %v3855_v34, %s4156_s27  ;;  %v570_v0 = vrot.slane %v568_v60, 5  ;;  %v359_v2 = vrot.slane %v357_v40, 4  ;;  %v370_v4 = vshrl.u32 %v4877_v49, 16  ;;  %v376_v39 = vshll.u32 %v4883_v3, 16  ;;  %v235_v24 = vld [vmem:[%s4201_s19 + $0x9c] sm:$0xf] }
  0xa8   : > { %v556_v5 = vrot.slane %v555_v13, 4  ;;  %v565_v6 = vor.u32 %v564_v62, %v560_v59  ;;  %v362_v14 = vrot.slane %v360_v63, 5  ;;  %v368_v16 = vrot.slane %v366_v12, 5  ;;  %v4894_v23 = vpop.permute.xlu1 %2347  ;;  %v4101_v60 = vld [vmem:[%s4201_s19 + $0x70] sm:$0xf] }
  0xa9   : > { %2749 = vrot.lane.b32.xlu0 %v3847_v55, %s4156_s27  ;;  %v372_v25 = vrot.slane %v370_v4, 4  ;;  %v4897_v26 = vpop.permute.xlu0 %2169  ;;  %v3717_v9 = vcombine.low %v4098_v27, %v4097_v33  ;;  %v378_v36 = vrot.slane %v376_v39, 5  ;;  %v3718_v42 = vcombine.low %v4100_v1, %v4099_v41  ;;  %v4102_v40 = vld [vmem:[%s4201_s19 + $0x6c] sm:$0xf]  ;;  %v4928_v62 = vld [vmem:[%s4201_s19 + $0xa0] sm:$0xf] }
  0xaa   : > { %v561_v19 = vsel %vm4290_vm5, %v556_v5, %v560_v59  ;;  %v566_v46 = vrot.slane %v565_v6, 4  ;;  %v363_v32 = vor.u32 %v362_v14, %v359_v2  ;;  %v3712_v53 = vrot.slane %v3696_v18, 9  ;;  %v4937_v2 = vld [vmem:[%s4201_s19 + $0xa4] sm:$0x1]  ;;  %v4104_v6 = vld [vmem:[%s4201_s19 + $0x60] sm:$0xf] }
  0xab   : > { %v373_v22 = vor.u32 %v372_v25, %v368_v16  ;;  %v2008_v37 = vrot.slane %v4772_v58, 5  ;;  %v2780_v47 = vsel %vm2777_vm6, %v3717_v9, %v2154_v52  ;;  %v2011_v17 = vrot.slane %v4816_v54, 5  ;;  %v4103_v5 = vld [vmem:[%s4201_s19 + $0x64] sm:$0xf] }
  0xac   : > { %v571_v35 = vsel %vm4290_vm5, %v566_v46, %v570_v0  ;;  %v364_v51 = vrot.slane %v363_v32, 4  ;;  %v4914_v43 = vpop.permute.xlu1 %2425  ;;  %v3704_v55 = vrot.slane %v3688_v8, 9  ;;  %v1952_v52 = vrot.slane %v4788_v45, 5  ;;  %v4953_v32 = vld [vmem:[%s4201_s19 + $0x40] sm:$0xf] }
  0xad   : > { %v3745_v61 = vcombine.low %v561_v19, %v571_v35  ;;  %v374_v44 = vrot.slane %v373_v22, 4  ;;  %v4912_v34 = vpop.permute.xlu0 %2331  ;;  %v2009_v58 = vsel %vm4232_vm2, %v3712_v53, %v2008_v37  ;;  %v2010_v38 = vrot.slane %v2008_v37, 4 }
  0xae   : > { %v369_v31 = vsel %vm4290_vm5, %v364_v51, %v368_v16  ;;  %v1955_v59 = vrot.slane %v4831_v50, 5  ;;  %v3726_v13 = vcombine.low %v4102_v40, %v4101_v60  ;;  %v4932_v12 = vsel %vm2777_vm6, %v3718_v42, %v4849_v29  ;;  %v219_v16 = vld [vmem:[%s4201_s19 + $0x3c] sm:$0xf] }
  0xaf   : > { %2177 = vrot.lane.b32.xlu1 %v3745_v61, %s4151_s22  ;;  %v379_v54 = vsel %vm4290_vm5, %v374_v44, %v378_v36  ;;  %v2012_v0 = vsel %vm4232_vm2, %v2010_v38, %v2011_v17  ;;  %v573_v45 = vshrl.u32 %v235_v24, 16  ;;  %v1953_v50 = vsel %vm4232_vm2, %v3704_v55, %v1952_v52 }
  0xb0   : > { %v3737_v63 = vcombine.low %v369_v31, %v379_v54  ;;  %v3856_v4 = vcombine.low %v2009_v58, %v2012_v0  ;;  %v1954_v39 = vrot.slane %v1952_v52, 4  ;;  %v3725_v14 = vcombine.low %v4104_v6, %v4103_v5  ;;  %v648_v0 = vld [vmem:[%s4201_s19 + $0x30] sm:$0xe] }
  0xb1   : > { %v4944_v18 = vpop.permute.xlu0 %2409  ;;  %v4949_v29 = vsel %vm2826_vm7, %v2780_v47, %v4819_v57  ;;  %v575_v25 = vrot.slane %v573_v45, 4  ;;  %v576_v19 = vshll.u32 %v235_v24, 16  ;;  %v582_v46 = vshll.u32 %v4928_v62, 16  ;;  %v4963_v57 = vld [vmem:[%s4201_s19 + $0x44] sm:$0x1] }
  0xb2   : > { %2161 = vrot.lane.b32.xlu0 %v3737_v63, %s4151_s22  ;;  %v1956_v33 = vsel %vm4232_vm2, %v1954_v39, %v1955_v59  ;;  %v2807_v27 = vsel %vm2777_vm6, %v3726_v13, %v4885_v10  ;;  %v586_v9 = vshrl.u32 %v4928_v62, 16  ;;  %v592_v22 = vshll.u32 %v4937_v2, 16 }
  0xb3   : > { %2767 = vrot.lane.b32.xlu1 %v3856_v4, %s4156_s27  ;;  %v4965_v36 = vpop.permute.xlu1 %2427  ;;  %v3848_v41 = vcombine.low %v1953_v50, %v1956_v33  ;;  %v578_v1 = vrot.slane %v576_v19, 5  ;;  %v584_v42 = vrot.slane %v582_v46, 5  ;;  %v381_v53 = vshrl.u32 %v219_v16, 16 }
  0xb4   : > { %v2804_v8 = vsel %vm2777_vm6, %v3725_v14, %v4897_v26  ;;  %v588_v35 = vrot.slane %v586_v9, 4  ;;  %v384_v51 = vshll.u32 %v219_v16, 16  ;;  %v390_v10 = vshll.u32 %v4953_v32, 16  ;;  %v656_v26 = vld [vmem:[%s4201_s19 + $0x90] sm:$0xe] }
  0xb5   : > { %v4970_v37 = vpop.permute.xlu0 %2411  ;;  %v579_v61 = vor.u32 %v578_v1, %v575_v25  ;;  %v383_v44 = vrot.slane %v381_v53, 4  ;;  %v394_v47 = vshrl.u32 %v4953_v32, 16  ;;  %v400_v17 = vshll.u32 %v4963_v57, 16 }
  0xb6   : > { %2751 = vrot.lane.b32.xlu0 %v3848_v41, %s4156_s27  ;;  %v589_v24 = vor.u32 %v588_v35, %v584_v42  ;;  %v594_v31 = vrot.slane %v592_v22, 5  ;;  %v386_v58 = vrot.slane %v384_v51, 5  ;;  %v392_v38 = vrot.slane %v390_v10, 5  ;;  %v649_v35 = vld [vmem:[%s4201_s19 + $0x3c] sm:$0xe] }
  0xb7   : > { %v4976_v55 = vpop.permute.xlu1 %2505  ;;  %v2844_v54 = vsel %vm2826_vm7, %v2804_v8, %v4800_v20  ;;  %v580_v52 = vrot.slane %v579_v61, 4  ;;  %v396_v59 = vrot.slane %v394_v47, 4  ;;  %v2846_v60 = vsel %vm2826_vm7, %v2807_v27, %v4824_v7 }
  0xb8   : > { %v590_v40 = vrot.slane %v589_v24, 4  ;;  %v387_v13 = vor.u32 %v386_v58, %v383_v44  ;;  %v402_v63 = vrot.slane %v400_v17, 5  ;;  %v2879_v39 = vsel %vm2859_vm8, %v2846_v60, %v4894_v23 }
  0xb9   : > { %v4983_v45 = vpop.permute.xlu0 %2489  ;;  %v585_v4 = vsel %vm4290_vm5, %v580_v52, %v584_v42  ;;  %v397_v50 = vor.u32 %v396_v59, %v392_v38  ;;  %v3553_v20 = vrot.slane %v656_v26, 9  ;;  %v797_v7 = vrot.slane %v4859_v56, 5  ;;  %v657_v42 = vld [vmem:[%s4201_s19 + $0x9c] sm:$0xe] }
  0xba   : > { %v595_v5 = vsel %vm4290_vm5, %v590_v40, %v594_v31  ;;  %v388_v6 = vrot.slane %v387_v13, 4  ;;  %v800_v14 = vrot.slane %v4869_v28, 5  ;;  %v3545_v46 = vrot.slane %v648_v0, 9  ;;  %v5033_v31 = vld [vmem:[%s4201_s19 + $0xa0] sm:$0xf] }
  0xbb   : > { %v4993_v16 = vpop.permute.xlu1 %2507  ;;  %v3746_v25 = vcombine.low %v585_v4, %v595_v5  ;;  %v398_v19 = vrot.slane %v397_v50, 4  ;;  %v741_v33 = vrot.slane %v4877_v49, 5  ;;  %v798_v27 = vsel %vm4232_vm2, %v3553_v20, %v797_v7  ;;  %v3565_v26 = vld [vmem:[%s4201_s19 + $0x3c] sm:$0xf]  ;;  %v3583_v4 = vld [vmem:[%s4201_s19 + $0xa8] sm:$0xf] }
  0xbc   : > { %v393_v23 = vsel %vm4290_vm5, %v388_v6, %v392_v38  ;;  %v799_v9 = vrot.slane %v797_v7, 4  ;;  %v744_v56 = vrot.slane %v4883_v3, 5  ;;  %v2830_v49 = vsel %vm2826_vm7, %v4932_v12, %v4844_v15 }
  0xbd   : > { %v5001_v22 = vpop.permute.xlu0 %2491  ;;  %2179 = vrot.lane.b32.xlu1 %v3746_v25, %s4151_s22  ;;  %v403_v28 = vsel %vm4290_vm5, %v398_v19, %v402_v63  ;;  %v742_v41 = vsel %vm4232_vm2, %v3545_v46, %v741_v33  ;;  %v743_v1 = vrot.slane %v741_v33, 4  ;;  %v2863_v3 = vsel %vm2859_vm8, %v2830_v49, %v4912_v34  ;;  %v5027_v34 = vld [vmem:[%s4201_s19 + $0x9c] sm:$0xf]  ;;  %v5062_v63 = vld [vmem:[%s4201_s19 + $0x40] sm:$0xf] }
  0xbe   : > { %v3738_v53 = vcombine.low %v393_v23, %v403_v28  ;;  %v801_v8 = vsel %vm4232_vm2, %v799_v9, %v800_v14  ;;  %v2877_v12 = vsel %vm2859_vm8, %v2844_v54, %v4757_v48  ;;  %v2861_v61 = vsel %vm2859_vm8, %v4949_v29, %v4794_v11  ;;  %v5072_v25 = vld [vmem:[%s4201_s19 + $0xac] sm:$0xf]  ;;  %v3567_v19 = vld [vmem:[%s4201_s19 + $0x48] sm:$0xf] }
  0xbf   : > { %v5017_v51 = vpop.permute.xlu1 %2601  ;;  %v3761_v10 = vcombine.low %v798_v27, %v801_v8  ;;  %v745_v15 = vsel %vm4232_vm2, %v743_v1, %v744_v56  ;;  %v3554_v47 = vrot.slane %v657_v42, 9  ;;  %v804_v17 = vrot.slane %v4928_v62, 5  ;;  %v5080_v9 = vld [vmem:[%s4201_s19 + $0x4c] sm:$0xf] }
  0xc0   : > { %2163 = vrot.lane.b32.xlu0 %v3738_v53, %s4151_s22  ;;  %v3753_v44 = vcombine.low %v742_v41, %v745_v15  ;;  %v807_v24 = vrot.slane %v4937_v2, 5  ;;  %v2910_v48 = vsel %vm2892_vm9, %v2877_v12, %v4914_v43  ;;  %v3546_v11 = vrot.slane %v649_v35, 9  ;;  %v5095_v35 = vld [vmem:[%s4201_s19 + $0xa4] sm:$0x1] }
  0xc1   : > { %v5035_v58 = vpop.permute.xlu0 %2585  ;;  %2257 = vrot.lane.b32.xlu1 %v3761_v10, %s4150_s21  ;;  %v748_v29 = vrot.slane %v4953_v32, 5  ;;  %v751_v38 = vrot.slane %v4963_v57, 5  ;;  %v2894_v62 = vsel %vm2892_vm9, %v2861_v61, %v4944_v18  ;;  %v805_v2 = vsel %vm4232_vm2, %v3554_v47, %v804_v17  ;;  %v5100_v61 = vld [vmem:[%s4201_s19 + $0x44] sm:$0x1] }
  0xc2   : > { %v806_v54 = vrot.slane %v804_v17, 4  ;;  %v1161_v52 = vshrl.u32 %v5027_v34, 16  ;;  %v2912_v57 = vsel %vm2892_vm9, %v2879_v39, %v4965_v36  ;;  %v1164_v60 = vshll.u32 %v5027_v34, 16 }
  0xc3   : > { %v5048_v59 = vpop.permute.xlu1 %2603  ;;  %v749_v43 = vsel %vm4232_vm2, %v3546_v11, %v748_v29  ;;  %v750_v32 = vrot.slane %v748_v29, 4  ;;  %v2896_v40 = vsel %vm2892_vm9, %v2863_v3, %v4970_v37  ;;  %v1174_v13 = vshrl.u32 %v5033_v31, 16 }
  0xc4   : > { %2241 = vrot.lane.b32.xlu0 %v3753_v44, %s4150_s21  ;;  %v808_v18 = vsel %vm4232_vm2, %v806_v54, %v807_v24  ;;  %v969_v0 = vshrl.u32 %v3565_v26, 16  ;;  %v1163_v20 = vrot.slane %v1161_v52, 4  ;;  %v972_v5 = vshll.u32 %v3565_v26, 16 }
  0xc5   : > { %v5065_v50 = vpop.permute.xlu0 %2587  ;;  %v3762_v36 = vcombine.low %v805_v2, %v808_v18  ;;  %v752_v39 = vsel %vm4232_vm2, %v750_v32, %v751_v38  ;;  %v1166_v7 = vrot.slane %v1164_v60, 5  ;;  %v3777_v37 = vcombine.low %v5027_v34, %v5033_v31  ;;  %v5121_v32 = vld [vmem:[%s4201_s19 + $0xb0] sm:$0x1] }
  0xc6   : > { %v3754_v6 = vcombine.low %v749_v43, %v752_v39  ;;  %v971_v14 = vrot.slane %v969_v0, 4  ;;  %v982_v33 = vshrl.u32 %v5062_v63, 16  ;;  %v1185_v23 = vshrl.u32 %v3583_v4, 16 }
  0xc7   : > { %v5075_v46 = vpop.permute.xlu1 %2681  ;;  %2259 = vrot.lane.b32.xlu1 %v3762_v36, %s4150_s21  ;;  %v1188_v27 = vshll.u32 %v3583_v4, 16  ;;  %v974_v56 = vrot.slane %v972_v5, 5  ;;  %v3769_v28 = vcombine.low %v3565_v26, %v5062_v63  ;;  %v2943_v49 = vsel %vm2925_vm10, %v2910_v48, %v4976_v55 }
  0xc8   : > { %2243 = vrot.lane.b32.xlu0 %v3754_v6, %s4150_s21  ;;  %v5088_v41 = vsel %vm2925_vm10, %v2894_v62, %v4983_v45  ;;  %v1187_v42 = vrot.slane %v1185_v23, 4  ;;  %v1198_v3 = vshrl.u32 %v5072_v25, 16  ;;  %v3778_v8 = vcombine.low %v3583_v4, %v5072_v25 }
  0xc9   : > { %v5090_v1 = vpop.permute.xlu0 %2665  ;;  %v1190_v53 = vrot.slane %v1188_v27, 5  ;;  %v993_v10 = vshrl.u32 %v3567_v19, 16  ;;  %v996_v15 = vshll.u32 %v3567_v19, 16  ;;  %v1006_v12 = vshrl.u32 %v5080_v9, 16 }
  0xca   : > { %v3770_v55 = vcombine.low %v3567_v19, %v5080_v9  ;;  %v5107_v34 = vsel %vm2925_vm10, %v2912_v57, %v4993_v16  ;;  %v5111_v44 = vsel %vm2925_vm10, %v2896_v40, %v5001_v22  ;;  %v1167_v47 = vor.u32 %v1166_v7, %v1163_v20 }
  0xcb   : > { %v5102_v45 = vpop.permute.xlu1 %2683  ;;  %2353 = vrot.lane.b32.xlu1 %v3777_v37, %s4149_s20  ;;  %v1170_v17 = vshll.u32 %v5033_v31, 16  ;;  %v1176_v24 = vrot.slane %v1174_v13, 4  ;;  %v1180_v48 = vshll.u32 %v5095_v35, 16  ;;  %v975_v11 = vor.u32 %v974_v56, %v971_v14  ;;  %v5134_v14 = vld [vmem:[%s4201_s19 + $0x50] sm:$0x1] }
  0xcc   : > { %2337 = vrot.lane.b32.xlu0 %v3769_v28, %s4149_s20  ;;  %v978_v29 = vshll.u32 %v5062_v63, 16  ;;  %v1168_v38 = vrot.slane %v1167_v47, 4  ;;  %v984_v16 = vrot.slane %v982_v33, 4  ;;  %v988_v62 = vshll.u32 %v5100_v61, 16 }
  0xcd   : > { %v1172_v26 = vrot.slane %v1170_v17, 5  ;;  %v5118_v2 = vpop.permute.xlu0 %2667  ;;  %v995_v22 = vrot.slane %v993_v10, 4  ;;  %v998_v54 = vrot.slane %v996_v15, 5  ;;  %v976_v52 = vrot.slane %v975_v11, 4  ;;  %v3617_v15 = vld [vmem:[%s4201_s19 + $0x9c] sm:$0xe] }
  0xce   : > { %v980_v43 = vrot.slane %v978_v29, 5  ;;  %v1182_v18 = vrot.slane %v1180_v48, 5  ;;  %v990_v0 = vrot.slane %v988_v62, 5  ;;  %v1191_v4 = vor.u32 %v1190_v53, %v1187_v42  ;;  %v3609_v48 = vld [vmem:[%s4201_s19 + $0x3c] sm:$0xe] }
  0xcf   : > { %2355 = vrot.lane.b32.xlu1 %v3778_v8, %s4149_s20  ;;  %v1173_v57 = vsel %vm4290_vm5, %v1168_v38, %v1172_v26  ;;  %v1177_v60 = vor.u32 %v1176_v24, %v1172_v26  ;;  %v5129_v36 = vpop.permute.xlu1 %2761  ;;  %v1194_v20 = vshll.u32 %v5072_v25, 16  ;;  %v1200_v5 = vrot.slane %v1198_v3, 4 }
  0xd0   : > { %2339 = vrot.lane.b32.xlu0 %v3770_v55, %s4149_s20  ;;  %v981_v40 = vsel %vm4290_vm5, %v976_v52, %v980_v43  ;;  %v985_v13 = vor.u32 %v984_v16, %v980_v43  ;;  %v1204_v6 = vshll.u32 %v5121_v32, 16  ;;  %v1192_v37 = vrot.slane %v1191_v4, 4  ;;  %v3618_v52 = vld [vmem:[%s4201_s19 + $0xa8] sm:$0xe] }
  0xd1   : > { %v1178_v39 = vrot.slane %v1177_v60, 4  ;;  %v999_v19 = vor.u32 %v998_v54, %v995_v22  ;;  %v1002_v33 = vshll.u32 %v5080_v9, 16  ;;  %v2976_v27 = vsel %vm2958_vm11, %v2943_v49, %v5017_v51  ;;  %v5141_v42 = vpop.permute.xlu0 %2745 }
  0xd2   : > { %v986_v7 = vrot.slane %v985_v13, 4  ;;  %v1196_v56 = vrot.slane %v1194_v20, 5  ;;  %v1008_v28 = vrot.slane %v1006_v12, 4  ;;  %v1206_v17 = vrot.slane %v1204_v6, 5 }
  0xd3   : > { %v1183_v23 = vsel %vm4290_vm5, %v1178_v39, %v1182_v18  ;;  %v1000_v8 = vrot.slane %v999_v19, 4  ;;  %v1004_v10 = vrot.slane %v1002_v33, 5  ;;  %v1012_v24 = vshll.u32 %v5134_v14, 16 }
  0xd4   : > { %v3793_v53 = vcombine.low %v1173_v57, %v1183_v23  ;;  %v991_v3 = vsel %vm4290_vm5, %v986_v7, %v990_v0  ;;  %v1201_v47 = vor.u32 %v1200_v5, %v1196_v56  ;;  %v2960_v51 = vsel %vm2958_vm11, %v5088_v41, %v5035_v58  ;;  %v3610_v0 = vld [vmem:[%s4201_s19 + $0x48] sm:$0xe] }
  0xd5   : > { %v3785_v55 = vcombine.low %v981_v40, %v991_v3  ;;  %v1197_v49 = vsel %vm4290_vm5, %v1192_v37, %v1196_v56  ;;  %v1005_v12 = vsel %vm4290_vm5, %v1000_v8, %v1004_v10  ;;  %v1009_v11 = vor.u32 %v1008_v28, %v1004_v10  ;;  %v5187_v37 = vld [vmem:[%s4201_s19 + $0xa8] sm:$0xf] }
  0xd6   : > { %2433 = vrot.lane.b32.xlu1 %v3793_v53, %s4152_s23  ;;  %v1202_v38 = vrot.slane %v1201_v47, 4  ;;  %v1014_v26 = vrot.slane %v1012_v24, 5  ;;  %v3633_v16 = vrot.slane %v3617_v15, 9  ;;  %v1406_v62 = vrot.slane %v5033_v31, 5  ;;  %v5201_v53 = vld [vmem:[%s4201_s19 + $0xac] sm:$0xf] }
  0xd7   : > { %v5156_v29 = vpop.permute.xlu1 %2173  ;;  %2417 = vrot.lane.b32.xlu0 %v3785_v55, %s4152_s23  ;;  %v1010_v22 = vrot.slane %v1009_v11, 4  ;;  %v1409_v58 = vrot.slane %v5095_v35, 5  ;;  %v3625_v41 = vrot.slane %v3609_v48, 9  ;;  %v1350_v54 = vrot.slane %v5062_v63, 5  ;;  %v3645_v3 = vld [vmem:[%s4201_s19 + $0x48] sm:$0xf] }
  0xd8   : > { %v1207_v43 = vsel %vm4290_vm5, %v1202_v38, %v1206_v17  ;;  %v1407_v57 = vsel %vm4232_vm2, %v3633_v16, %v1406_v62  ;;  %v1408_v60 = vrot.slane %v1406_v62, 4  ;;  %v1353_v18 = vrot.slane %v5100_v61, 5  ;;  %v5222_v15 = vld [vmem:[%s4201_s19 + $0x4c] sm:$0xf]  ;;  %v5225_v55 = vld [vmem:[%s4201_s19 + $0xb4] sm:$0xf] }
  0xd9   : > { %v3794_v31 = vcombine.low %v1197_v49, %v1207_v43  ;;  %v1015_v35 = vsel %vm4290_vm5, %v1010_v22, %v1014_v26  ;;  %v1351_v63 = vsel %vm4232_vm2, %v3625_v41, %v1350_v54  ;;  %v1352_v13 = vrot.slane %v1350_v54, 4  ;;  %v5239_v11 = vld [vmem:[%s4201_s19 + $0x54] sm:$0xf] }
  0xda   : > { %v5168_v40 = vpop.permute.xlu0 %2157  ;;  %v3786_v4 = vcombine.low %v1005_v12, %v1015_v35  ;;  %v1410_v39 = vsel %vm4232_vm2, %v1408_v60, %v1409_v58  ;;  %v3634_v20 = vrot.slane %v3618_v52, 9  ;;  %v2978_v61 = vsel %vm2958_vm11, %v5107_v34, %v5048_v59  ;;  %v5236_v12 = vld [vmem:[%s4201_s19 + $0xb8] sm:$0xf]  ;;  %v4078_v35 = vld [vmem:[%s6126_s1 + $0x10] ss:$0 sps:$4 sm:$0x33]  }
  0xdb   : > { %2435 = vrot.lane.b32.xlu1 %v3794_v31, %s4152_s23  ;;  %v2962_v5 = vsel %vm2958_vm11, %v5111_v44, %v5065_v50  ;;  %v3809_v6 = vcombine.low %v1407_v57, %v1410_v39  ;;  %v1354_v7 = vsel %vm4232_vm2, %v1352_v13, %v1353_v18  ;;  %v5189_v19 = vpop.permute.xlu1 %2763  ;;  %v1413_v23 = vrot.slane %v5072_v25, 5  ;;  %v5246_v58 = vld [vmem:[%s4201_s19 + $0x58] sm:$0xf]  ;;  %4011 = vmatprep.subr.msk.bf16.mxu0 %vm3117_vm15, %v4078_v35 }
  0xdc   : > { %2419 = vrot.lane.b32.xlu0 %v3786_v4, %s4152_s23  ;;  %v3801_v33 = vcombine.low %v1351_v63, %v1354_v7  ;;  %v1416_v59 = vrot.slane %v5121_v32, 5  ;;  %v3626_v34 = vrot.slane %v3610_v0, 9  ;;  %v3009_v56 = vsel %vm2991_vm12, %v2976_v27, %v5075_v46  ;;  %v5266_v4 = vld [vmem:[%s4201_s19 + $0xb0] sm:$0x1]  ;;  %4012 = vmatprep.subr.msk.bf16.mxu1 %vm3117_vm15, %v4078_v35 }
  0xdd   : > { %v2993_v50 = vsel %vm2991_vm12, %v2960_v51, %v5090_v1  ;;  %v1357_v44 = vrot.slane %v5080_v9, 5  ;;  %v1360_v28 = vrot.slane %v5134_v14, 5  ;;  %v1414_v25 = vsel %vm4232_vm2, %v3634_v20, %v1413_v23 }
  0xde   : > { %v1415_v32 = vrot.slane %v1413_v23, 4  ;;  %v1770_v8 = vshrl.u32 %v5187_v37, 16  ;;  %v1773_v46 = vshll.u32 %v5187_v37, 16  ;;  %v5208_v27 = vpop.permute.xlu0 %2747  ;;  %v5215_v14 = vsel %vm2991_vm12, %v2978_v61, %v5102_v45 }
  0xdf   : > { %2513 = vrot.lane.b32.xlu1 %v3809_v6, %s4153_s24  ;;  %v1358_v9 = vsel %vm4232_vm2, %v3626_v34, %v1357_v44  ;;  %v1359_v1 = vrot.slane %v1357_v44, 4  ;;  %v5219_v10 = vsel %vm2991_vm12, %v2962_v5, %v5118_v2  ;;  %v1783_v17 = vshrl.u32 %v5201_v53, 16  ;;  %v5295_v44 = vld [vmem:[%s4201_s19 + $0x7c] sm:$0xf] }
  0xe0   : > { %2497 = vrot.lane.b32.xlu0 %v3801_v33, %s4153_s24  ;;  %v1417_v47 = vsel %vm4232_vm2, %v1415_v32, %v1416_v59  ;;  %v3825_v45 = vcombine.low %v5187_v37, %v5201_v53  ;;  %v1578_v24 = vshrl.u32 %v3645_v3, 16  ;;  %v1772_v51 = vrot.slane %v1770_v8, 4  ;;  %v5287_v59 = vld [vmem:[%s4201_s19 + $0x50] sm:$0x1] }
  0xe1   : > { %v3810_v48 = vcombine.low %v1414_v25, %v1417_v47  ;;  %v1361_v2 = vsel %vm4232_vm2, %v1359_v1, %v1360_v28  ;;  %v1581_v49 = vshll.u32 %v3645_v3, 16  ;;  %v1775_v16 = vrot.slane %v1773_v46, 5  ;;  %v5303_v25 = vld [vmem:[%s4201_s19 + $0x1c] sm:$0xf] }
  0xe2   : > { %v3802_v26 = vcombine.low %v1358_v9, %v1361_v2  ;;  %v1591_v62 = vshrl.u32 %v5222_v15, 16  ;;  %v1794_v22 = vshrl.u32 %v5225_v55, 16  ;;  %v1580_v41 = vrot.slane %v1578_v24, 4 }
  0xe3   : > { %v5241_v38 = vpop.permute.xlu1 %2175  ;;  %2515 = vrot.lane.b32.xlu1 %v3810_v48, %s4153_s24  ;;  %v1583_v54 = vrot.slane %v1581_v49, 5  ;;  %v3817_v52 = vcombine.low %v3645_v3, %v5222_v15  ;;  %v1797_v43 = vshll.u32 %v5225_v55, 16  ;;  %v1807_v57 = vshrl.u32 %v5236_v12, 16  ;;  %v5300_v3 = vld [vmem:[%s4201_s19 + $0x18] sm:$0xf] }
  0xe4   : > { %2499 = vrot.lane.b32.xlu0 %v3802_v26, %s4153_s24  ;;  %v3826_v60 = vcombine.low %v5225_v55, %v5236_v12  ;;  %v1602_v18 = vshrl.u32 %v5239_v11, 16  ;;  %v1605_v31 = vshll.u32 %v5239_v11, 16  ;;  %v5262_v13 = vrot.slane %v1794_v22, 4 }
  0xe5   : > { %v1615_v0 = vshrl.u32 %v5246_v58, 16  ;;  %v1799_v20 = vrot.slane %v1797_v43, 5  ;;  %v3818_v61 = vcombine.low %v5239_v11, %v5246_v58  ;;  %v3026_v5 = vsel %vm3024_vm13, %v2993_v50, %v5141_v42  ;;  %v5292_v50 = vld [vmem:[%s4201_s19 + $0x78] sm:$0xf] }
  0xe6   : > { %v5260_v63 = vpop.permute.xlu0 %2159  ;;  %v3042_v6 = vsel %vm3024_vm13, %v3009_v56, %v5129_v36  ;;  %v5277_v7 = vrot.slane %v1602_v18, 4  ;;  %v5279_v37 = vrot.slane %v1605_v31, 5  ;;  %3973 = vmatprep.mubr.msk.bf16.mxu0 %vm3084_vm14, %v3026_v5  ;;  %v1776_v33 = vor.u32 %v1775_v16, %v1772_v51  ;;  %v5319_v51 = vld [vmem:[%s4201_s19 + $0xbc] sm:$0x1] }
  0xe7   : > { %v5268_v39 = vpop.permute.xlu1 %2253  ;;  %2609 = vrot.lane.b32.xlu1 %v3825_v45, %s4154_s25  ;;  %3989 = vmatprep.mubr.msk.bf16.mxu1 %vm3084_vm14, %v3042_v6  ;;  %v1779_v42 = vshll.u32 %v5201_v53, 16  ;;  %v1785_v36 = vrot.slane %v1783_v17, 4  ;;  %v1789_v23 = vshll.u32 %v5266_v4, 16  ;;  %v1584_v34 = vor.u32 %v1583_v54, %v1580_v41  ;;  %v5339_v31 = vld [vmem:[%s4201_s19 + $0x5c] sm:$0x1] }
  0xe8   : > { %2593 = vrot.lane.b32.xlu0 %v3817_v52, %s4154_s25  ;;  %v3727_v28 = vcombine.low %v5292_v50, %v5295_v44  ;;  %v3719_v32 = vcombine.low %v5300_v3, %v5303_v25  ;;  %v1777_v8 = vrot.slane %v1776_v33, 4  ;;  %v1587_v46 = vshll.u32 %v5222_v15, 16  ;;  %v3697_v6 = vld [vmem:[%s4201_s19 + $0xa8] sm:$0xe] }
  0xe9   : > { %v1781_v1 = vrot.slane %v1779_v42, 5  ;;  %v1791_v55 = vrot.slane %v1789_v23, 5  ;;  %v1585_v47 = vrot.slane %v1584_v34, 4  ;;  %v1593_v17 = vrot.slane %v1591_v62, 4  ;;  %v4110_v25 = vld [vmem:[%s4201_s19 + $0x88] sm:$0xf] }
  0xea   : > { %v5289_v56 = vpop.permute.xlu0 %2237  ;;  %v1589_v45 = vrot.slane %v1587_v46, 5  ;;  %v1597_v24 = vshll.u32 %v5287_v59, 16  ;;  %v3119_v48 = vsel %vm3117_vm15, %v4078_v35, 0  ;;  %v3044_v2 = vsel %vm3024_vm13, %v5215_v14, %v5189_v19 }
  0xeb   : > { %v5310_v9 = vpop.permute.xlu1 %2255  ;;  %2611 = vrot.lane.b32.xlu1 %v3826_v60, %s4154_s25  ;;  %v1782_v49 = vsel %vm4290_vm5, %v1777_v8, %v1781_v1  ;;  %v1786_v11 = vor.u32 %v1785_v36, %v1781_v1  ;;  %3972 = vmatpush3.bf16.msra.mxu0 %v3119_v48  ;;  %v3028_v26 = vsel %vm3024_vm13, %v5219_v10, %v5208_v27  ;;  %v1803_v16 = vshll.u32 %v5236_v12, 16 }
  0xec   : > { %2595 = vrot.lane.b32.xlu0 %v3818_v61, %s4154_s25  ;;  %v1590_v19 = vsel %vm4290_vm5, %v1585_v47, %v1589_v45  ;;  %v1594_v14 = vor.u32 %v1593_v17, %v1589_v45  ;;  %v1599_v22 = vrot.slane %v1597_v24, 5  ;;  %4010 = vmatpush3.bf16.msra.mxu1 %v3119_v48  ;;  %v1800_v41 = vor.u32 %v1799_v20, %v5262_v13  ;;  %v3689_v47 = vld [vmem:[%s4201_s19 + $0x48] sm:$0xe] }
  0xed   : > { %v1787_v52 = vrot.slane %v1786_v11, 4  ;;  %v1805_v43 = vrot.slane %v1803_v16, 5  ;;  %v1809_v27 = vrot.slane %v1807_v57, 4  ;;  %v1813_v10 = vshll.u32 %v5319_v51, 16 }
  0xee   : > { %v5328_v62 = vpop.permute.xlu0 %2239  ;;  %v1595_v60 = vrot.slane %v1594_v14, 4  ;;  %v1801_v18 = vrot.slane %v1800_v41, 4  ;;  %v1608_v35 = vor.u32 %v5279_v37, %v5277_v7  ;;  %v1611_v61 = vshll.u32 %v5246_v58, 16  ;;  %3974 = vmatmul.mubr.msk.bf16.vlgmr.msra.gmra.mrb[0].mxu0 %vm3084_vm14, %v3028_v26  ;;  %v4112_v14 = vld [vmem:[%s4201_s19 + $0x28] sm:$0xf] }
  0xef   : > { %v5333_v54 = vpop.permute.xlu1 %2349  ;;  %v1792_v13 = vsel %vm4290_vm5, %v1787_v52, %v1791_v55  ;;  %v1810_v20 = vor.u32 %v1809_v27, %v1805_v43  ;;  %v1815_v5 = vrot.slane %v1813_v10, 5  ;;  %v1617_v57 = vrot.slane %v1615_v0, 4  ;;  %3990 = vmatmul.mubr.msk.bf16.vlgmr.msra.gmra.mrb[0].mxu1 %vm3084_vm14, %v3044_v2  ;;  %v5405_v10 = vld [vmem:[%s4201_s19 + $0xb0] sm:$0x1] }
  0xf0   : > { %v3841_v42 = vcombine.low %v1782_v49, %v1792_v13  ;;  %v1600_v7 = vsel %vm4290_vm5, %v1595_v60, %v1599_v22  ;;  %v1806_v37 = vsel %vm4290_vm5, %v1801_v18, %v1805_v43  ;;  %v1609_v36 = vrot.slane %v1608_v35, 4  ;;  %v5398_v43 = vld [vmem:[%s4201_s19 + $0xac] sm:$0xf]  ;;  %v221_v35 = vld [vmem:[%s4201_s19 + $0x48] sm:$0xf] }
  0xf1   : > { %v3833_v34 = vcombine.low %v1590_v19, %v1600_v7  ;;  %v1811_v8 = vrot.slane %v1810_v20, 4  ;;  %v1613_v46 = vrot.slane %v1611_v61, 5  ;;  %v1621_v0 = vshll.u32 %v5339_v31, 16  ;;  %v4111_v19 = vld [vmem:[%s4201_s19 + $0x24] sm:$0xf] }
  0xf2   : > { %v5351_v33 = vpop.permute.xlu0 %2333  ;;  %2689 = vrot.lane.b32.xlu1 %v3841_v42, %s4155_s26  ;;  %v3713_v1 = vrot.slane %v3697_v6, 9  ;;  %v2015_v55 = vrot.slane %v5201_v53, 5  ;;  %v5368_v17 = vsel %vm2777_vm6, %v3727_v28, %v5156_v29  ;;  %v5380_v29 = vsel %vm2777_vm6, %v3719_v32, %v5168_v40  ;;  %v237_v28 = vld [vmem:[%s4201_s19 + $0xa8] sm:$0xf]  ;;  %v4109_v40 = vld [vmem:[%s4201_s19 + $0x84] sm:$0xf] }
  0xf3   : > { %v5357_v23 = vpop.permute.xlu1 %2351  ;;  %2673 = vrot.lane.b32.xlu0 %v3833_v34, %s4155_s26  ;;  %v1816_v45 = vsel %vm4290_vm5, %v1811_v8, %v1815_v5  ;;  %v1618_v24 = vor.u32 %v1617_v57, %v1613_v46  ;;  %v1623_v48 = vrot.slane %v1621_v0, 5  ;;  %v1614_v50 = vsel %vm4290_vm5, %v1609_v36, %v1613_v46  ;;  %v5415_v7 = vld [vmem:[%s4201_s19 + $0x4c] sm:$0xf]  ;;  %v5429_v46 = vld [vmem:[%s4201_s19 + $0x50] sm:$0x1] }
  0xf4   : > { %v3842_v53 = vcombine.low %v1806_v37, %v1816_v45  ;;  %v2016_v44 = vsel %vm4232_vm2, %v3713_v1, %v2015_v55  ;;  %v2017_v11 = vrot.slane %v2015_v55, 4  ;;  %v2018_v26 = vrot.slane %v5266_v4, 5 }
  0xf5   : > { %v1619_v49 = vrot.slane %v1618_v24, 4  ;;  %v3705_v16 = vrot.slane %v3689_v47, 9  ;;  %v3728_v32 = vcombine.low %v4109_v40, %v4110_v25  ;;  %v3720_v22 = vcombine.low %v4111_v19, %v4112_v14  ;;  %v3690_v14 = vld [vmem:[%s4201_s19 + $0x54] sm:$0xe] }
  0xf6   : > { %v5373_v2 = vpop.permute.xlu0 %2335  ;;  %2691 = vrot.lane.b32.xlu1 %v3842_v53, %s4155_s26  ;;  %v1959_v41 = vrot.slane %v5222_v15, 5  ;;  %v1962_v52 = vrot.slane %v5287_v59, 5  ;;  %v2019_v27 = vsel %vm4232_vm2, %v2017_v11, %v2018_v26  ;;  %v597_v60 = vshrl.u32 %v237_v28, 16  ;;  %v3698_v26 = vld [vmem:[%s4201_s19 + $0xb4] sm:$0xe] }
  0xf7   : > { %v1624_v4 = vsel %vm4290_vm5, %v1619_v49, %v1623_v48  ;;  %v600_v18 = vshll.u32 %v237_v28, 16  ;;  %v3857_v13 = vcombine.low %v2016_v44, %v2019_v27  ;;  %v606_v6 = vshll.u32 %v5398_v43, 16 }
  0xf8   : > { %v5388_v3 = vpop.permute.xlu1 %2429  ;;  %v3834_v15 = vcombine.low %v1614_v50, %v1624_v4  ;;  %v1960_v59 = vsel %vm4232_vm2, %v3705_v16, %v1959_v41  ;;  %v1961_v20 = vrot.slane %v1959_v41, 4  ;;  %v599_v5 = vrot.slane %v597_v60, 4 }
  0xf9   : > { %v602_v57 = vrot.slane %v600_v18, 5  ;;  %v610_v42 = vshrl.u32 %v5398_v43, 16  ;;  %v5422_v36 = vsel %vm2777_vm6, %v3728_v32, %v5241_v38  ;;  %v616_v8 = vshll.u32 %v5405_v10, 16 }
  0xfa   : > { %v5408_v61 = vpop.permute.xlu0 %2413  ;;  %2675 = vrot.lane.b32.xlu0 %v3834_v15, %s4155_s26  ;;  %2769 = vrot.lane.b32.xlu1 %v3857_v13, %s4156_s27  ;;  %v1963_v34 = vsel %vm4232_vm2, %v1961_v20, %v1962_v52  ;;  %v405_v0 = vshrl.u32 %v221_v35, 16  ;;  %v608_v47 = vrot.slane %v606_v6, 5  ;;  %v408_v53 = vshll.u32 %v221_v35, 16  ;;  %v5464_v15 = vld [vmem:[%s4201_s19 + $0xb4] sm:$0xf] }
  0xfb   : > { %v3849_v1 = vcombine.low %v1960_v59, %v1963_v34  ;;  %v603_v55 = vor.u32 %v602_v57, %v599_v5  ;;  %v612_v45 = vrot.slane %v610_v42, 4  ;;  %v618_v38 = vrot.slane %v616_v8, 5  ;;  %v5474_v34 = vld [vmem:[%s4201_s19 + $0xb8] sm:$0xf] }
  0xfc   : > { %v5417_v37 = vpop.permute.xlu1 %2431  ;;  %v407_v48 = vrot.slane %v405_v0, 4  ;;  %v414_v50 = vshll.u32 %v5415_v7, 16  ;;  %v418_v49 = vshrl.u32 %v5415_v7, 16  ;;  %v424_v11 = vshll.u32 %v5429_v46, 16 }
  0xfd   : > { %v604_v44 = vrot.slane %v603_v55, 4  ;;  %v613_v28 = vor.u32 %v612_v45, %v608_v47  ;;  %v5441_v40 = vsel %vm2777_vm6, %v3720_v22, %v5260_v63  ;;  %v5447_v25 = vsel %vm2826_vm7, %v5368_v17, %v5268_v39 }
  0xfe   : > { %v5431_v24 = vpop.permute.xlu0 %2415  ;;  %2753 = vrot.lane.b32.xlu0 %v3849_v1, %s4156_s27  ;;  %v410_v32 = vrot.slane %v408_v53, 5  ;;  %v416_v19 = vrot.slane %v414_v50, 5  ;;  %v5453_v41 = vsel %vm2826_vm7, %v5380_v29, %v5289_v56  ;;  %v420_v52 = vrot.slane %v418_v49, 4 }
  0xff   : > { %v609_v63 = vsel %vm4290_vm5, %v604_v44, %v608_v47  ;;  %v614_v22 = vrot.slane %v613_v28, 4  ;;  %v426_v60 = vrot.slane %v424_v11, 5  ;;  %v3714_v39 = vrot.slane %v3698_v26, 9  ;;  %v5485_v47 = vld [vmem:[%s4201_s19 + $0xbc] sm:$0x1] }
 0x100   : > { %v5437_v16 = vpop.permute.xlu1 %2509  ;;  %v411_v27 = vor.u32 %v410_v32, %v407_v48  ;;  %v2022_v17 = vrot.slane %v5236_v12, 5  ;;  %v421_v35 = vor.u32 %v420_v52, %v416_v19  ;;  %v2025_v56 = vrot.slane %v5319_v51, 5  ;;  %v5500_v26 = vld [vmem:[%s4201_s19 + $0x58] sm:$0xf] }
 0x101   : > { %v619_v18 = vsel %vm4290_vm5, %v614_v22, %v618_v38  ;;  %v3706_v29 = vrot.slane %v3690_v14, 9  ;;  %v814_v12 = vrot.slane %v5405_v10, 5  ;;  %v1966_v42 = vrot.slane %v5246_v58, 5 }
 0x102   : > { %v5457_v4 = vpop.permute.xlu0 %2493  ;;  %v3747_v59 = vcombine.low %v609_v63, %v619_v18  ;;  %v412_v20 = vrot.slane %v411_v27, 4  ;;  %v2023_v5 = vsel %vm4232_vm2, %v3714_v39, %v2022_v17  ;;  %v2024_v57 = vrot.slane %v2022_v17, 4  ;;  %v5507_v63 = vld [vmem:[%s4201_s19 + $0x5c] sm:$0x1] }
 0x103   : > { %v422_v6 = vrot.slane %v421_v35, 4  ;;  %v1969_v51 = vrot.slane %v5339_v31, 5  ;;  %v758_v1 = vrot.slane %v5429_v46, 5  ;;  %v621_v58 = vshrl.u32 %v5464_v15, 16  ;;  %v5489_v31 = vld [vmem:[%s4201_s19 + $0x54] sm:$0xf] }
 0x104   : > { %v5466_v13 = vpop.permute.xlu1 %2511  ;;  %2181 = vrot.lane.b32.xlu1 %v3747_v59, %s4151_s22  ;;  %v417_v0 = vsel %vm4290_vm5, %v412_v20, %v416_v19  ;;  %v2026_v55 = vsel %vm4232_vm2, %v2024_v57, %v2025_v56  ;;  %v1967_v48 = vsel %vm4232_vm2, %v3706_v29, %v1966_v42  ;;  %v1968_v53 = vrot.slane %v1966_v42, 4  ;;  %v658_v59 = vld [vmem:[%s4201_s19 + $0xa8] sm:$0xe] }
 0x105   : > { %v427_v45 = vsel %vm4290_vm5, %v422_v6, %v426_v60  ;;  %v3858_v38 = vcombine.low %v2023_v5, %v2026_v55  ;;  %v623_v28 = vrot.slane %v621_v58, 4  ;;  %v624_v49 = vshll.u32 %v5464_v15, 16 }
 0x106   : > { %v5476_v8 = vpop.permute.xlu0 %2495  ;;  %v3739_v44 = vcombine.low %v417_v0, %v427_v45  ;;  %v630_v11 = vshll.u32 %v5474_v34, 16  ;;  %v1970_v32 = vsel %vm4232_vm2, %v1968_v53, %v1969_v51  ;;  %v634_v19 = vshrl.u32 %v5474_v34, 16  ;;  %v650_v51 = vld [vmem:[%s4201_s19 + $0x48] sm:$0xe] }
 0x107   : > { %v640_v14 = vshll.u32 %v5485_v47, 16  ;;  %v429_v22 = vshrl.u32 %v5489_v31, 16  ;;  %v3850_v27 = vcombine.low %v1967_v48, %v1970_v32  ;;  %v626_v60 = vrot.slane %v624_v49, 5 }
 0x108   : > { %v5495_v50 = vpop.permute.xlu1 %2605  ;;  %2165 = vrot.lane.b32.xlu0 %v3739_v44, %s4151_s22  ;;  %2771 = vrot.lane.b32.xlu1 %v3858_v38, %s4156_s27  ;;  %v632_v39 = vrot.slane %v630_v11, 5  ;;  %v432_v17 = vshll.u32 %v5489_v31, 16  ;;  %v2850_v18 = vsel %vm2826_vm7, %v5422_v36, %v5310_v9  ;;  %v636_v35 = vrot.slane %v634_v19, 4 }
 0x109   : > { %v431_v56 = vrot.slane %v429_v22, 4  ;;  %v438_v29 = vshll.u32 %v5500_v26, 16  ;;  %v627_v5 = vor.u32 %v626_v60, %v623_v28  ;;  %v442_v6 = vshrl.u32 %v5500_v26, 16 }
 0x10a   : > { %v5510_v52 = vpop.permute.xlu0 %2589  ;;  %v434_v57 = vrot.slane %v432_v17, 5  ;;  %v448_v42 = vshll.u32 %v5507_v63, 16  ;;  %v2834_v0 = vsel %vm2826_vm7, %v5441_v40, %v5328_v62  ;;  %v637_v55 = vor.u32 %v636_v35, %v632_v39 }
 0x10b   : > { %v642_v9 = vrot.slane %v640_v14, 5  ;;  %v440_v36 = vrot.slane %v438_v29, 5  ;;  %v628_v58 = vrot.slane %v627_v5, 4  ;;  %v444_v38 = vrot.slane %v442_v6, 4  ;;  %v659_v14 = vld [vmem:[%s4201_s19 + $0xb4] sm:$0xe] }
 0x10c   : > { %v5520_v20 = vpop.permute.xlu1 %2607  ;;  %2755 = vrot.lane.b32.xlu0 %v3850_v27, %s4156_s27  ;;  %v435_v45 = vor.u32 %v434_v57, %v431_v56  ;;  %v450_v48 = vrot.slane %v448_v42, 5  ;;  %v638_v44 = vrot.slane %v637_v55, 4  ;;  %v3555_v28 = vrot.slane %v658_v59, 9 }
 0x10d   : > { %v811_v49 = vrot.slane %v5398_v43, 5  ;;  %v3547_v11 = vrot.slane %v650_v51, 9  ;;  %v633_v62 = vsel %vm4290_vm5, %v628_v58, %v632_v39  ;;  %v445_v32 = vor.u32 %v444_v38, %v440_v36  ;;  %v5576_v38 = vld [vmem:[%s4201_s19 + $0x54] sm:$0xf] }
 0x10e   : > { %v5529_v53 = vpop.permute.xlu0 %2591  ;;  %v436_v40 = vrot.slane %v435_v45, 4  ;;  %v755_v19 = vrot.slane %v5415_v7, 5  ;;  %v2881_v22 = vsel %vm2859_vm8, %v5447_v25, %v5333_v54  ;;  %v643_v27 = vsel %vm4290_vm5, %v638_v44, %v642_v9  ;;  %v651_v54 = vld [vmem:[%s4201_s19 + $0x54] sm:$0xe] }
 0x10f   : > { %v812_v43 = vsel %vm4232_vm2, %v3555_v28, %v811_v49  ;;  %v813_v60 = vrot.slane %v811_v49, 4  ;;  %v2865_v39 = vsel %vm2859_vm8, %v5453_v41, %v5351_v33  ;;  %v3748_v35 = vcombine.low %v633_v62, %v643_v27  ;;  %v3585_v9 = vld [vmem:[%s4201_s19 + $0xb4] sm:$0xf]  ;;  %v5598_v62 = vld [vmem:[%s4201_s19 + $0x58] sm:$0xf] }
 0x110   : > { %v441_v7 = vsel %vm4290_vm5, %v436_v40, %v440_v36  ;;  %v446_v56 = vrot.slane %v445_v32, 4  ;;  %v756_v29 = vsel %vm4232_vm2, %v3547_v11, %v755_v19  ;;  %v757_v59 = vrot.slane %v755_v19, 4  ;;  %v3587_v32 = vld [vmem:[%s4201_s19 + $0xc0] sm:$0xf] }
 0x111   : > { %v5543_v17 = vpop.permute.xlu1 %2685  ;;  %v815_v25 = vsel %vm4232_vm2, %v813_v60, %v814_v12  ;;  %v3556_v5 = vrot.slane %v659_v14, 9  ;;  %2183 = vrot.lane.b32.xlu1 %v3748_v35, %s4151_s22  ;;  %v818_v57 = vrot.slane %v5474_v34, 5  ;;  %v821_v6 = vrot.slane %v5485_v47, 5 }
 0x112   : > { %v451_v33 = vsel %vm4290_vm5, %v446_v56, %v450_v48  ;;  %v3763_v41 = vcombine.low %v812_v43, %v815_v25  ;;  %v5562_v10 = vpop.permute.xlu0 %2669  ;;  %v759_v42 = vsel %vm4232_vm2, %v757_v59, %v758_v1  ;;  %v3548_v51 = vrot.slane %v651_v54, 9 }
 0x113   : > { %v3740_v12 = vcombine.low %v441_v7, %v451_v33  ;;  %v762_v55 = vrot.slane %v5500_v26, 5  ;;  %v2883_v36 = vsel %vm2859_vm8, %v2850_v18, %v5357_v23  ;;  %v819_v58 = vsel %vm4232_vm2, %v3556_v5, %v818_v57  ;;  %v5584_v18 = vld [vmem:[%s4201_s19 + $0xb8] sm:$0xf]  ;;  %v3571_v7 = vld [vmem:[%s4201_s19 + $0x60] sm:$0xf] }
 0x114   : > { %v820_v47 = vrot.slane %v818_v57, 4  ;;  %v765_v45 = vrot.slane %v5507_v63, 5  ;;  %v2867_v46 = vsel %vm2859_vm8, %v2834_v0, %v5373_v2  ;;  %v3755_v1 = vcombine.low %v756_v29, %v759_v42  ;;  %v5621_v29 = vld [vmem:[%s4201_s19 + $0x64] sm:$0xf]  ;;  %v5634_v57 = vld [vmem:[%s4201_s19 + $0xbc] sm:$0x1] }
 0x115   : > { %2167 = vrot.lane.b32.xlu0 %v3740_v12, %s4151_s22  ;;  %v2914_v48 = vsel %vm2892_vm9, %v2881_v22, %v5388_v3  ;;  %v764_v23 = vrot.slane %v762_v55, 4  ;;  %v5586_v44 = vpop.permute.xlu1 %2687  ;;  %2261 = vrot.lane.b32.xlu1 %v3763_v41, %s4150_s21  ;;  %v763_v28 = vsel %vm4232_vm2, %v3548_v51, %v762_v55  ;;  %v1209_v49 = vshrl.u32 %v3585_v9, 16 }
 0x116   : > { %v822_v63 = vsel %vm4232_vm2, %v820_v47, %v821_v6  ;;  %v1212_v2 = vshll.u32 %v3585_v9, 16  ;;  %v2898_v0 = vsel %vm2892_vm9, %v2865_v39, %v5408_v61  ;;  %v1017_v40 = vshrl.u32 %v5576_v38, 16 }
 0x117   : > { %v3764_v3 = vcombine.low %v819_v58, %v822_v63  ;;  %v766_v11 = vsel %vm4232_vm2, %v764_v23, %v765_v45  ;;  %v2916_v19 = vsel %vm2892_vm9, %v2883_v36, %v5417_v37  ;;  %v5606_v14 = vsel %vm2892_vm9, %v2867_v46, %v5431_v24  ;;  %v5610_v27 = vpop.permute.xlu0 %2671  ;;  %v5615_v37 = vld [vmem:[%s4201_s19 + $0xc4] sm:$0xf] }
 0x118   : > { %v1222_v61 = vshrl.u32 %v5584_v18, 16  ;;  %v1020_v22 = vshll.u32 %v5576_v38, 16  ;;  %v3756_v43 = vcombine.low %v763_v28, %v766_v11  ;;  %v1211_v60 = vrot.slane %v1209_v49, 4  ;;  %v5654_v11 = vld [vmem:[%s4201_s19 + $0xc8] sm:$0x1] }
 0x119   : > { %2245 = vrot.lane.b32.xlu0 %v3755_v1, %s4150_s21  ;;  %v1214_v39 = vrot.slane %v1212_v2, 5  ;;  %v3779_v35 = vcombine.low %v3585_v9, %v5584_v18  ;;  %2263 = vrot.lane.b32.xlu1 %v3764_v3, %s4150_s21  ;;  %v1019_v24 = vrot.slane %v1017_v40, 4  ;;  %v1030_v56 = vshrl.u32 %v5598_v62, 16  ;;  %v5636_v6 = vpop.permute.xlu1 %2765  ;;  %v5641_v9 = vld [vmem:[%s4201_s19 + $0x5c] sm:$0x1] }
 0x11a   : > { %v1233_v54 = vshrl.u32 %v3587_v32, 16  ;;  %v1236_v25 = vshll.u32 %v3587_v32, 16  ;;  %v1022_v59 = vrot.slane %v1020_v22, 5  ;;  %v3771_v5 = vcombine.low %v5576_v38, %v5598_v62 }
 0x11b   : > { %v5627_v33 = vsel %vm2925_vm10, %v2914_v48, %v5437_v16  ;;  %v5631_v41 = vsel %vm2925_vm10, %v2898_v0, %v5457_v4  ;;  %v1246_v12 = vshrl.u32 %v5615_v37, 16  ;;  %v3780_v42 = vcombine.low %v3587_v32, %v5615_v37  ;;  %v5649_v1 = vpop.permute.xlu0 %2749 }
 0x11c   : > { %v1041_v51 = vshrl.u32 %v3571_v7, 16  ;;  %v1044_v55 = vshll.u32 %v3571_v7, 16  ;;  %v1235_v16 = vrot.slane %v1233_v54, 4  ;;  %v1238_v36 = vrot.slane %v1236_v25, 5 }
 0x11d   : > { %2247 = vrot.lane.b32.xlu0 %v3756_v43, %s4150_s21  ;;  %v1054_v58 = vshrl.u32 %v5621_v29, 16  ;;  %v3772_v4 = vcombine.low %v3571_v7, %v5621_v29  ;;  %2357 = vrot.lane.b32.xlu1 %v3779_v35, %s4149_s20  ;;  %v1215_v47 = vor.u32 %v1214_v39, %v1211_v60  ;;  %v1218_v45 = vshll.u32 %v5584_v18, 16 }
 0x11e   : > { %v1224_v38 = vrot.slane %v1222_v61, 4  ;;  %v1228_v46 = vshll.u32 %v5634_v57, 16  ;;  %v1023_v48 = vor.u32 %v1022_v59, %v1019_v24  ;;  %v1026_v23 = vshll.u32 %v5598_v62, 16 }
 0x11f   : > { %v1032_v63 = vrot.slane %v1030_v56, 4  ;;  %v1036_v28 = vshll.u32 %v5641_v9, 16  ;;  %v1043_v49 = vrot.slane %v1041_v51, 4  ;;  %v1046_v2 = vrot.slane %v1044_v55, 5 }
 0x120   : > { %v1216_v0 = vrot.slane %v1215_v47, 4  ;;  %v1220_v3 = vrot.slane %v1218_v45, 5  ;;  %v5659_v40 = vsel %vm2925_vm10, %v2916_v19, %v5466_v13  ;;  %v1230_v32 = vrot.slane %v1228_v46, 5 }
 0x121   : > { %2341 = vrot.lane.b32.xlu0 %v3771_v5, %s4149_s20  ;;  %v1024_v61 = vrot.slane %v1023_v48, 4  ;;  %v1028_v22 = vrot.slane %v1026_v23, 5  ;;  %v5661_v43 = vpop.permute.xlu1 %2177  ;;  %2359 = vrot.lane.b32.xlu1 %v3780_v42, %s4149_s20  ;;  %v1038_v39 = vrot.slane %v1036_v28, 5  ;;  %v1239_v35 = vor.u32 %v1238_v36, %v1235_v16  ;;  %v5669_v5 = vld [vmem:[%s4201_s19 + $0x68] sm:$0x1] }
 0x122   : > { %v1225_v60 = vor.u32 %v1224_v38, %v1220_v3  ;;  %v1242_v7 = vshll.u32 %v5615_v37, 16  ;;  %v1221_v24 = vsel %vm4290_vm5, %v1216_v0, %v1220_v3  ;;  %v1248_v54 = vrot.slane %v1246_v12, 4  ;;  %v3619_v48 = vld [vmem:[%s4201_s19 + $0xb4] sm:$0xe] }
 0x123   : > { %v1033_v56 = vor.u32 %v1032_v63, %v1028_v22  ;;  %v1252_v13 = vshll.u32 %v5654_v11, 16  ;;  %v1240_v25 = vrot.slane %v1239_v35, 4  ;;  %v1047_v51 = vor.u32 %v1046_v2, %v1043_v49  ;;  %v3611_v49 = vld [vmem:[%s4201_s19 + $0x54] sm:$0xe] }
 0x124   : > { %v1226_v19 = vrot.slane %v1225_v60, 4  ;;  %v1244_v59 = vrot.slane %v1242_v7, 5  ;;  %v5671_v42 = vpop.permute.xlu0 %2161  ;;  %v1029_v55 = vsel %vm4290_vm5, %v1024_v61, %v1028_v22  ;;  %v1050_v12 = vshll.u32 %v5621_v29, 16 }
 0x125   : > { %2343 = vrot.lane.b32.xlu0 %v3772_v4, %s4149_s20  ;;  %v1034_v16 = vrot.slane %v1033_v56, 4  ;;  %v1056_v36 = vrot.slane %v1054_v58, 4  ;;  %v1254_v38 = vrot.slane %v1252_v13, 5  ;;  %v1048_v46 = vrot.slane %v1047_v51, 4  ;;  %v5684_v2 = vpop.permute.xlu1 %2767 }
 0x126   : > { %v1231_v47 = vsel %vm4290_vm5, %v1226_v19, %v1230_v32  ;;  %v1249_v45 = vor.u32 %v1248_v54, %v1244_v59  ;;  %v1052_v28 = vrot.slane %v1050_v12, 5  ;;  %v1060_v4 = vshll.u32 %v5669_v5, 16 }
 0x127   : > { %v3795_v23 = vcombine.low %v1221_v24, %v1231_v47  ;;  %v1039_v63 = vsel %vm4290_vm5, %v1034_v16, %v1038_v39  ;;  %v2933_v58 = vsel %vm2925_vm10, %v5606_v14, %v5476_v8  ;;  %v1245_v3 = vsel %vm4290_vm5, %v1240_v25, %v1244_v59  ;;  %v3620_v24 = vld [vmem:[%s4201_s19 + $0xc0] sm:$0xe] }
 0x128   : > { %v3787_v0 = vcombine.low %v1029_v55, %v1039_v63  ;;  %v1250_v32 = vrot.slane %v1249_v45, 4  ;;  %v1053_v61 = vsel %vm4290_vm5, %v1048_v46, %v1052_v28  ;;  %v1057_v22 = vor.u32 %v1056_v36, %v1052_v28  ;;  %v5700_v56 = vpop.permute.xlu0 %2751  ;;  %v3612_v55 = vld [vmem:[%s4201_s19 + $0x60] sm:$0xe] }
 0x129   : > { %2437 = vrot.lane.b32.xlu1 %v3795_v23, %s4152_s23  ;;  %v1062_v60 = vrot.slane %v1060_v4, 5  ;;  %v3635_v39 = vrot.slane %v3619_v48, 9  ;;  %v1420_v8 = vrot.slane %v5584_v18, 5  ;;  %v1423_v14 = vrot.slane %v5634_v57, 5  ;;  %v3665_v48 = vld [vmem:[%s4201_s19 + $0xc0] sm:$0xf] }
 0x12a   : > { %2421 = vrot.lane.b32.xlu0 %v3787_v0, %s4152_s23  ;;  %v1255_v35 = vsel %vm4290_vm5, %v1250_v32, %v1254_v38  ;;  %v3627_v7 = vrot.slane %v3611_v49, 9  ;;  %v1058_v13 = vrot.slane %v1057_v22, 4  ;;  %v1364_v19 = vrot.slane %v5598_v62, 5  ;;  %v5733_v4 = vld [vmem:[%s4201_s19 + $0x60] sm:$0xf] }
 0x12b   : > { %v3796_v54 = vcombine.low %v1245_v3, %v1255_v35  ;;  %v1367_v25 = vrot.slane %v5641_v9, 5  ;;  %v2980_v59 = vsel %vm2958_vm11, %v5627_v33, %v5495_v50  ;;  %v2964_v18 = vsel %vm2958_vm11, %v5631_v41, %v5510_v52  ;;  %v5752_v22 = vld [vmem:[%s4201_s19 + $0xc4] sm:$0xf]  ;;  %v3667_v35 = vld [vmem:[%s4201_s19 + $0xcc] sm:$0xf] }
 0x12c   : > { %v1421_v57 = vsel %vm4232_vm2, %v3635_v39, %v1420_v8  ;;  %v1422_v51 = vrot.slane %v1420_v8, 4  ;;  %v1063_v62 = vsel %vm4290_vm5, %v1058_v13, %v1062_v60  ;;  %v1365_v9 = vsel %vm4232_vm2, %v3627_v7, %v1364_v19  ;;  %v5767_v7 = vld [vmem:[%s4201_s19 + $0x6c] sm:$0xf] }
 0x12d   : > { %2439 = vrot.lane.b32.xlu1 %v3796_v54, %s4152_s23  ;;  %v1366_v16 = vrot.slane %v1364_v19, 4  ;;  %v3636_v50 = vrot.slane %v3620_v24, 9  ;;  %v3788_v52 = vcombine.low %v1053_v61, %v1063_v62  ;;  %v1427_v12 = vrot.slane %v5615_v37, 5 }
 0x12e   : > { %v1424_v41 = vsel %vm4232_vm2, %v1422_v51, %v1423_v14  ;;  %v1430_v36 = vrot.slane %v5654_v11, 5  ;;  %v3628_v38 = vrot.slane %v3612_v55, 9  ;;  %v1371_v46 = vrot.slane %v5621_v29, 5  ;;  %v5786_v55 = vld [vmem:[%s4201_s19 + $0x70] sm:$0xf] }
 0x12f   : > { %v5718_v33 = vpop.permute.xlu1 %2179  ;;  %v3811_v47 = vcombine.low %v1421_v57, %v1424_v41  ;;  %v1368_v45 = vsel %vm4232_vm2, %v1366_v16, %v1367_v25  ;;  %2423 = vrot.lane.b32.xlu0 %v3788_v52, %s4152_s23  ;;  %v1428_v63 = vsel %vm4232_vm2, %v3636_v50, %v1427_v12  ;;  %v1429_v28 = vrot.slane %v1427_v12, 4  ;;  %v5775_v25 = vld [vmem:[%s4201_s19 + $0x64] sm:$0xf] }
 0x130   : > { %v3803_v23 = vcombine.low %v1365_v9, %v1368_v45  ;;  %v1374_v37 = vrot.slane %v5669_v5, 5  ;;  %v2982_v29 = vsel %vm2958_vm11, %v5659_v40, %v5520_v20  ;;  %v2966_v49 = vsel %vm2958_vm11, %v2933_v58, %v5529_v53 }
 0x131   : > { %2517 = vrot.lane.b32.xlu1 %v3811_v47, %s4153_s24  ;;  %v1372_v0 = vsel %vm4232_vm2, %v3628_v38, %v1371_v46  ;;  %v1373_v3 = vrot.slane %v1371_v46, 4  ;;  %v3013_v5 = vsel %vm2991_vm12, %v2980_v59, %v5543_v17  ;;  %v1431_v61 = vsel %vm4232_vm2, %v1429_v28, %v1430_v36 }
 0x132   : > { %v5735_v11 = vpop.permute.xlu0 %2163  ;;  %v1818_v20 = vshrl.u32 %v3665_v48, 16  ;;  %v1821_v40 = vshll.u32 %v3665_v48, 16  ;;  %v2997_v53 = vsel %vm2991_vm12, %v2964_v18, %v5562_v10  ;;  %v3812_v58 = vcombine.low %v1428_v63, %v1431_v61 }
 0x133   : > { %v5745_v32 = vpop.permute.xlu1 %2257  ;;  %v1375_v60 = vsel %vm4232_vm2, %v1373_v3, %v1374_v37  ;;  %v1626_v39 = vshrl.u32 %v5733_v4, 16  ;;  %2501 = vrot.lane.b32.xlu0 %v3803_v23, %s4153_s24  ;;  %v3015_v8 = vsel %vm2991_vm12, %v2982_v29, %v5586_v44  ;;  %v2999_v14 = vsel %vm2991_vm12, %v2966_v49, %v5610_v27  ;;  %v5780_v27 = vld [vmem:[%s4201_s19 + $0xd0] sm:$0xf] }
 0x134   : > { %v3804_v17 = vcombine.low %v1372_v0, %v1375_v60  ;;  %v1629_v10 = vshll.u32 %v5733_v4, 16  ;;  %v1820_v54 = vrot.slane %v1818_v20, 4  ;;  %v1831_v13 = vshrl.u32 %v5752_v22, 16 }
 0x135   : > { %2519 = vrot.lane.b32.xlu1 %v3812_v58, %s4153_s24  ;;  %v3827_v19 = vcombine.low %v3665_v48, %v5752_v22  ;;  %v3046_v44 = vsel %vm3024_vm13, %v3013_v5, %v5636_v6  ;;  %v1823_v59 = vrot.slane %v1821_v40, 5  ;;  %v3030_v18 = vsel %vm3024_vm13, %v2997_v53, %v5649_v1  ;;  %v5792_v6 = vld [vmem:[%s4201_s19 + $0xc8] sm:$0x1] }
 0x136   : > { %v5769_v24 = vpop.permute.xlu0 %2241  ;;  %v1842_v57 = vshrl.u32 %v3667_v35, 16  ;;  %v1845_v51 = vshll.u32 %v3667_v35, 16  ;;  %3993 = vmatprep.mubr.msk.bf16.mxu1 %vm3084_vm14, %v3046_v44  ;;  %v1628_v62 = vrot.slane %v1626_v39, 4  ;;  %v1631_v9 = vrot.slane %v1629_v10, 5  ;;  %3977 = vmatprep.mubr.msk.bf16.mxu0 %vm3084_vm14, %v3030_v18  ;;  %v5824_v10 = vld [vmem:[%s4201_s19 + $0xd4] sm:$0x1] }
 0x137   : > { %v1650_v16 = vshrl.u32 %v5767_v7, 16  ;;  %v1653_v50 = vshll.u32 %v5767_v7, 16  ;;  %2503 = vrot.lane.b32.xlu0 %v3804_v17, %s4153_s24  ;;  %v1639_v1 = vshrl.u32 %v5775_v25, 16  ;;  %v3819_v41 = vcombine.low %v5733_v4, %v5775_v25  ;;  %v5811_v4 = vld [vmem:[%s4201_s19 + $0x68] sm:$0x1] }
 0x138   : > { %v1855_v12 = vshrl.u32 %v5780_v27, 16  ;;  %v3828_v36 = vcombine.low %v3667_v35, %v5780_v27  ;;  %v1844_v45 = vrot.slane %v1842_v57, 4  ;;  %v1847_v38 = vrot.slane %v1845_v51, 5 }
 0x139   : > { %v5794_v52 = vpop.permute.xlu1 %2259  ;;  %2613 = vrot.lane.b32.xlu1 %v3827_v19, %s4154_s25  ;;  %v1663_v46 = vshrl.u32 %v5786_v55, 16  ;;  %v3820_v48 = vcombine.low %v5767_v7, %v5786_v55  ;;  %v1824_v23 = vor.u32 %v1823_v59, %v1820_v54  ;;  %v1827_v63 = vshll.u32 %v5752_v22, 16 }
 0x13a   : > { %v5802_v47 = vpop.permute.xlu0 %2243  ;;  %v1833_v28 = vrot.slane %v1831_v13, 4  ;;  %v1837_v37 = vshll.u32 %v5792_v6, 16  ;;  %v1652_v29 = vrot.slane %v1650_v16, 4  ;;  %v1655_v49 = vrot.slane %v1653_v50, 5 }
 0x13b   : > { %v1632_v0 = vor.u32 %v1631_v9, %v1628_v62  ;;  %v1635_v3 = vshll.u32 %v5775_v25, 16  ;;  %2597 = vrot.lane.b32.xlu0 %v3819_v41, %s4154_s25  ;;  %v1825_v61 = vrot.slane %v1824_v23, 4  ;;  %v1829_v20 = vrot.slane %v1827_v63, 5 }
 0x13c   : > { %v1839_v40 = vrot.slane %v1837_v37, 5  ;;  %v1641_v53 = vrot.slane %v1639_v1, 4  ;;  %v1645_v35 = vshll.u32 %v5811_v4, 16  ;;  %v3048_v17 = vsel %vm3024_vm13, %v3015_v8, %v5684_v2  ;;  %v5835_v2 = vld [vmem:[%s4201_s19 + $0x74] sm:$0x1] }
 0x13d   : > { %v5814_v5 = vpop.permute.xlu1 %2353  ;;  %2615 = vrot.lane.b32.xlu1 %v3828_v36, %s4154_s25  ;;  %v1633_v60 = vrot.slane %v1632_v0, 4  ;;  %v1637_v39 = vrot.slane %v1635_v3, 5  ;;  %v1830_v7 = vsel %vm4290_vm5, %v1825_v61, %v1829_v20  ;;  %v1834_v54 = vor.u32 %v1833_v28, %v1829_v20  ;;  %3994 = vmatmul.mubr.msk.bf16.gmra.mrb[4].mxu1 %vm3084_vm14, %v3048_v17 }
 0x13e   : > { %v5817_v58 = vpop.permute.xlu0 %2337  ;;  %v3032_v13 = vsel %vm3024_vm13, %v2999_v14, %v5700_v56  ;;  %v1848_v19 = vor.u32 %v1847_v38, %v1844_v45  ;;  %v1647_v18 = vrot.slane %v1645_v35, 5  ;;  %v1851_v57 = vshll.u32 %v5780_v27, 16 }
 0x13f   : > { %v1638_v44 = vsel %vm4290_vm5, %v1633_v60, %v1637_v39  ;;  %v1642_v59 = vor.u32 %v1641_v53, %v1637_v39  ;;  %3978 = vmatmul.mubr.msk.bf16.gmra.mrb[4].mxu0 %vm3084_vm14, %v3032_v13  ;;  %2599 = vrot.lane.b32.xlu0 %v3820_v48, %s4154_s25  ;;  %v1835_v8 = vrot.slane %v1834_v54, 4  ;;  %v1857_v56 = vrot.slane %v1855_v12, 4  ;;  %v3699_v48 = vld [vmem:[%s4201_s19 + $0xc0] sm:$0xe]  ;;  %v3700_v54 = vld [vmem:[%s4201_s19 + $0xcc] sm:$0xe] }
 0x140   : > { %v1849_v51 = vrot.slane %v1848_v19, 4  ;;  %v1861_v14 = vshll.u32 %v5824_v10, 16  ;;  %v1853_v16 = vrot.slane %v1851_v57, 5  ;;  %v1656_v50 = vor.u32 %v1655_v49, %v1652_v29  ;;  %v3691_v49 = vld [vmem:[%s4201_s19 + $0x60] sm:$0xe] }
 0x141   : > { %v5840_v62 = vpop.permute.xlu1 %2355  ;;  %v1643_v9 = vrot.slane %v1642_v59, 4  ;;  %v1659_v1 = vshll.u32 %v5786_v55, 16  ;;  %v1840_v36 = vsel %vm4290_vm5, %v1835_v8, %v1839_v40  ;;  %v1665_v45 = vrot.slane %v1663_v46, 4  ;;  %v3692_v57 = vld [vmem:[%s4201_s19 + $0x6c] sm:$0xe] }
 0x142   : > { %v5843_v41 = vpop.permute.xlu0 %2339  ;;  %v1669_v38 = vshll.u32 %v5835_v2, 16  ;;  %v3843_v12 = vcombine.low %v1830_v7, %v1840_v36  ;;  %v1858_v63 = vor.u32 %v1857_v56, %v1853_v16  ;;  %v1863_v28 = vrot.slane %v1861_v14, 5 }
 0x143   : > { %v1648_v23 = vsel %vm4290_vm5, %v1643_v9, %v1647_v18  ;;  %v1657_v0 = vrot.slane %v1656_v50, 4  ;;  %v1661_v29 = vrot.slane %v1659_v1, 5  ;;  %v1854_v3 = vsel %vm4290_vm5, %v1849_v51, %v1853_v16 }
 0x144   : > { %v3835_v37 = vcombine.low %v1638_v44, %v1648_v23  ;;  %2693 = vrot.lane.b32.xlu1 %v3843_v12, %s4155_s26  ;;  %v1859_v46 = vrot.slane %v1858_v63, 4  ;;  %v3715_v61 = vrot.slane %v3699_v48, 9  ;;  %v1671_v40 = vrot.slane %v1669_v38, 5 }
 0x145   : > { %v1666_v20 = vor.u32 %v1665_v45, %v1661_v29  ;;  %v2029_v53 = vrot.slane %v5752_v22, 5  ;;  %v2032_v60 = vrot.slane %v5792_v6, 5  ;;  %v1662_v17 = vsel %vm4290_vm5, %v1657_v0, %v1661_v29 }
 0x146   : > { %2677 = vrot.lane.b32.xlu0 %v3835_v37, %s4155_s26  ;;  %v1864_v35 = vsel %vm4290_vm5, %v1859_v46, %v1863_v28  ;;  %v3707_v7 = vrot.slane %v3691_v49, 9  ;;  %v1973_v6 = vrot.slane %v5775_v25, 5  ;;  %v1976_v18 = vrot.slane %v5811_v4, 5 }
 0x147   : > { %v3844_v19 = vcombine.low %v1854_v3, %v1864_v35  ;;  %v1667_v44 = vrot.slane %v1666_v20, 4  ;;  %v2030_v59 = vsel %vm4232_vm2, %v3715_v61, %v2029_v53  ;;  %v2031_v22 = vrot.slane %v2029_v53, 4  ;;  %v4113_v53 = vld [vmem:[%s4201_s19 + $0x90] sm:$0xf] }
 0x148   : > { %v5858_v39 = vpop.permute.xlu1 %2433  ;;  %v3716_v56 = vrot.slane %v3700_v54, 9  ;;  %v2036_v14 = vrot.slane %v5780_v27, 5  ;;  %v1974_v50 = vsel %vm4232_vm2, %v3707_v7, %v1973_v6  ;;  %v1975_v25 = vrot.slane %v1973_v6, 4  ;;  %v4115_v7 = vld [vmem:[%s4201_s19 + $0x30] sm:$0xf] }
 0x149   : > { %v5865_v13 = vpop.permute.xlu0 %2417  ;;  %2695 = vrot.lane.b32.xlu1 %v3844_v19, %s4155_s26  ;;  %v1672_v8 = vsel %vm4290_vm5, %v1667_v44, %v1671_v40  ;;  %v2033_v51 = vsel %vm4232_vm2, %v2031_v22, %v2032_v60  ;;  %v2039_v36 = vrot.slane %v5824_v10, 5  ;;  %v3708_v30 = vrot.slane %v3692_v57, 9  ;;  %v4114_v60 = vld [vmem:[%s4201_s19 + $0x94] sm:$0xf] }
 0x14a   : > { %v3836_v9 = vcombine.low %v1662_v17, %v1672_v8  ;;  %v3859_v16 = vcombine.low %v2030_v59, %v2033_v51  ;;  %v2037_v4 = vsel %vm4232_vm2, %v3716_v56, %v2036_v14  ;;  %v2038_v1 = vrot.slane %v2036_v14, 4  ;;  %v4116_v54 = vld [vmem:[%s4201_s19 + $0x34] sm:$0xf] }
 0x14b   : > { %v1977_v27 = vsel %vm4232_vm2, %v1975_v25, %v1976_v18  ;;  %v1980_v38 = vrot.slane %v5786_v55, 5  ;;  %v1983_v48 = vrot.slane %v5835_v2, 5  ;;  %v3729_v35 = vcombine.low %v4113_v53, %v4114_v60 }
 0x14c   : > { %2679 = vrot.lane.b32.xlu0 %v3836_v9, %s4155_s26  ;;  %v3851_v23 = vcombine.low %v1974_v50, %v1977_v27  ;;  %v2040_v10 = vsel %vm4232_vm2, %v2038_v1, %v2039_v36  ;;  %v3721_v19 = vcombine.low %v4115_v7, %v4116_v54  ;;  %v4118_v50 = vld [vmem:[%s4201_s19 + $0xa0] sm:$0xf]  ;;  %v4119_v36 = vld [vmem:[%s4201_s19 + $0x3c] sm:$0xf] }
 0x14d   : > { %v5883_v45 = vpop.permute.xlu1 %2435  ;;  %2773 = vrot.lane.b32.xlu1 %v3859_v16, %s4156_s27  ;;  %v3860_v63 = vcombine.low %v2037_v4, %v2040_v10  ;;  %v1981_v28 = vsel %vm4232_vm2, %v3708_v30, %v1980_v38  ;;  %v1982_v37 = vrot.slane %v1980_v38, 4  ;;  %v2816_v21 = vsel %vm2777_vm6, %v3729_v35, %v5661_v43  ;;  %v4117_v16 = vld [vmem:[%s4201_s19 + $0x9c] sm:$0xf]  ;;  %v4120_v30 = vld [vmem:[%s4201_s19 + $0x40] sm:$0xf] }
 0x14e   : > { %v5890_v12 = vpop.permute.xlu0 %2419  ;;  %v2852_v59 = vsel %vm2826_vm7, %v2816_v21, %v5745_v32  ;;  %v2792_v57 = vsel %vm2777_vm6, %v3721_v19, %v5671_v42  ;;  %v3722_v27 = vcombine.low %v4119_v36, %v4120_v30 }
 0x14f   : > { %v1984_v55 = vsel %vm4232_vm2, %v1982_v37, %v1983_v48  ;;  %v2885_v22 = vsel %vm2859_vm8, %v2852_v59, %v5814_v5  ;;  %v2836_v8 = vsel %vm2826_vm7, %v2792_v57, %v5769_v24 }
 0x150   : > { %2757 = vrot.lane.b32.xlu0 %v3851_v23, %s4156_s27  ;;  %v3852_v29 = vcombine.low %v1981_v28, %v1984_v55  ;;  %v2918_v18 = vsel %vm2892_vm9, %v2885_v22, %v5858_v39  ;;  %v2869_v32 = vsel %vm2859_vm8, %v2836_v8, %v5817_v58  ;;  %v3730_v58 = vcombine.low %v4117_v16, %v4118_v50 }
 0x151   : > { %v2514_v0 = vpop.permute.xlu1 %2513  ;;  %2775 = vrot.lane.b32.xlu1 %v3860_v63, %s4156_s27  ;;  %v2902_v39 = vsel %vm2892_vm9, %v2869_v32, %v5865_v13  ;;  %v2795_v63 = vsel %vm2777_vm6, %v3722_v27, %v5735_v11  ;;  %v4122_v32 = vld [vmem:[%s4201_s19 + $0xac] sm:$0xf]  ;;  %v3732_v16 = vcombine.low %v5464_v15, %v5474_v34  ;;  %v3724_v50 = vcombine.low %v5489_v31, %v5500_v26 }
 0x152   : > { %v2498_v2 = vpop.permute.xlu0 %2497  ;;  %v2951_v43 = vsel %vm2925_vm10, %v2918_v18, %v2514_v0  ;;  %v2819_v13 = vsel %vm2777_vm6, %v3730_v58, %v5718_v33  ;;  %v2838_v33 = vsel %vm2826_vm7, %v2795_v63, %v5802_v47 }
 0x153   : > { %v2935_v9 = vsel %vm2925_vm10, %v2902_v39, %v2498_v2  ;;  %v2854_v38 = vsel %vm2826_vm7, %v2819_v13, %v5794_v52  ;;  %v2871_v52 = vsel %vm2859_vm8, %v2838_v33, %v5843_v41  ;;  %v4124_v39 = vld [vmem:[%s4201_s19 + $0x4c] sm:$0xf] }
 0x154   : > { %2759 = vrot.lane.b32.xlu0 %v3852_v29, %s4156_s27  ;;  %v2887_v48 = vsel %vm2859_vm8, %v2854_v38, %v5840_v62 }
 0x155   : > { %v2516_v49 = vpop.permute.xlu1 %2515  ;;  %v2920_v10 = vsel %vm2892_vm9, %v2887_v48, %v5883_v45  ;;  %v2904_v45 = vsel %vm2892_vm9, %v2871_v52, %v5890_v12 }
 0x156   : > { %v2500_v3 = vpop.permute.xlu0 %2499  ;;  %v2953_v28 = vsel %vm2925_vm10, %v2920_v10, %v2516_v49 }
 0x157   : > { %v2937_v11 = vsel %vm2925_vm10, %v2904_v45, %v2500_v3 }
 0x159   : > { %v2610_v46 = vpop.permute.xlu1 %2609 }
 0x15a   : > { %v2594_v61 = vpop.permute.xlu0 %2593  ;;  %v2984_v51 = vsel %vm2958_vm11, %v2951_v43, %v2610_v46 }
 0x15b   : > { %v2968_v24 = vsel %vm2958_vm11, %v2935_v9, %v2594_v61 }
 0x15d   : > { %v2612_v20 = vpop.permute.xlu1 %2611 }
 0x15e   : > { %v2596_v40 = vpop.permute.xlu0 %2595  ;;  %v2986_v37 = vsel %vm2958_vm11, %v2953_v28, %v2612_v20 }
 0x15f   : > { %v2970_v47 = vsel %vm2958_vm11, %v2937_v11, %v2596_v40 }
 0x164   : > { %v2690_v17 = vpop.permute.xlu1 %2689 }
 0x165   : > { %v2674_v44 = vpop.permute.xlu0 %2673  ;;  %v3017_v5 = vsel %vm2991_vm12, %v2984_v51, %v2690_v17  ;;  %v4121_v51 = vld [vmem:[%s4201_s19 + $0xa8] sm:$0xf] }
 0x166   : > { %v3001_v25 = vsel %vm2991_vm12, %v2968_v24, %v2674_v44 }
 0x168   : > { %v2692_v6 = vpop.permute.xlu1 %2691 }
 0x169   : > { %v3019_v0 = vsel %vm2991_vm12, %v2986_v37, %v2692_v6 }
 0x16c   : > { %v2676_v56 = vpop.permute.xlu0 %2675  ;;  %v2770_v14 = vpop.permute.xlu1 %2769 }
 0x16d   : > { %v3050_v42 = vsel %vm3024_vm13, %v3017_v5, %v2770_v14  ;;  %v3003_v29 = vsel %vm2991_vm12, %v2970_v47, %v2676_v56  ;;  %v3731_v5 = vcombine.low %v4121_v51, %v4122_v32  ;;  %v4123_v14 = vld [vmem:[%s4201_s19 + $0x48] sm:$0xf] }
 0x16e   : > { %3997 = vmatprep.mubr.msk.bf16.mxu1 %vm3084_vm14, %v3050_v42  ;;  %v3723_v42 = vcombine.low %v4123_v14, %v4124_v39 }
 0x170   : > { %v2754_v4 = vpop.permute.xlu0 %2753 }
 0x171   : > { %v3034_v1 = vsel %vm3024_vm13, %v3001_v25, %v2754_v4 }
 0x172   : > { %3981 = vmatprep.mubr.msk.bf16.mxu0 %vm3084_vm14, %v3034_v1 }
 0x176   : > { %v2182_v23 = vpop.permute.xlu1 %2181 }
 0x177   : > { %v2822_v24 = vsel %vm2777_vm6, %v3731_v5, %v2182_v23  ;;  %v5988_v23 = vld [vmem:[%s6127_s2] ss:$0 sm:$0xff] }
 0x17a   : > { %v2166_v62 = vpop.permute.xlu0 %2165  ;;  %v2772_v55 = vpop.permute.xlu1 %2771 }
 0x17b   : > { %v3052_v2 = vsel %vm3024_vm13, %v3019_v0, %v2772_v55  ;;  %v2798_v1 = vsel %vm2777_vm6, %v3723_v42, %v2166_v62 }
 0x17c   : > { %3998 = vmatmul.mubr.msk.bf16.gmra.mrb[8].mxu1 %vm3084_vm14, %v3052_v2 }
 0x17e   : > { %v2756_v49 = vpop.permute.xlu0 %2755 }
 0x17f   : > { %v3036_v41 = vsel %vm3024_vm13, %v3003_v29, %v2756_v49 }
 0x180   : > { %3982 = vmatmul.mubr.msk.bf16.gmra.mrb[8].mxu0 %vm3084_vm14, %v3036_v41 }
 0x183   : > { %v2184_v46 = vpop.permute.xlu1 %2183 }
 0x184   : > { %v2825_v36 = vsel %vm2777_vm6, %v3732_v16, %v2184_v46 }
 0x187   : > { %v2168_v61 = vpop.permute.xlu0 %2167  ;;  %v2262_v20 = vpop.permute.xlu1 %2261 }
 0x188   : > { %v2856_v58 = vsel %vm2826_vm7, %v2822_v24, %v2262_v20  ;;  %v2801_v30 = vsel %vm2777_vm6, %v3724_v50, %v2168_v61 }
 0x18b   : > { %v2246_v53 = vpop.permute.xlu0 %2245  ;;  %v2264_v12 = vpop.permute.xlu1 %2263 }
 0x18c   : > { %v2840_v15 = vsel %vm2826_vm7, %v2798_v1, %v2246_v53  ;;  %v2858_v31 = vsel %vm2826_vm7, %v2825_v36, %v2264_v12 }
 0x18f   : > { %v2248_v60 = vpop.permute.xlu0 %2247  ;;  %v2358_v35 = vpop.permute.xlu1 %2357 }
 0x190   : > { %v2889_v25 = vsel %vm2859_vm8, %v2856_v58, %v2358_v35  ;;  %v2842_v26 = vsel %vm2826_vm7, %v2801_v30, %v2248_v60 }
 0x193   : > { %v2342_v3 = vpop.permute.xlu0 %2341  ;;  %v2360_v17 = vpop.permute.xlu1 %2359 }
 0x194   : > { %v2873_v27 = vsel %vm2859_vm8, %v2840_v15, %v2342_v3  ;;  %v2891_v10 = vsel %vm2859_vm8, %v2858_v31, %v2360_v17 }
 0x197   : > { %v2344_v21 = vpop.permute.xlu0 %2343 }
 0x198   : > { %v2875_v63 = vsel %vm2859_vm8, %v2842_v26, %v2344_v21 }
 0x19b   : > { %v2438_v40 = vpop.permute.xlu1 %2437 }
 0x19c   : > { %v2422_v7 = vpop.permute.xlu0 %2421  ;;  %v2922_v13 = vsel %vm2892_vm9, %v2889_v25, %v2438_v40 }
 0x19d   : > { %v2906_v28 = vsel %vm2892_vm9, %v2873_v27, %v2422_v7 }
 0x19f   : > { %v2440_v54 = vpop.permute.xlu1 %2439 }
 0x1a0   : > { %v2924_v52 = vsel %vm2892_vm9, %v2891_v10, %v2440_v54 }
 0x1a1   : > { %v2424_v19 = vpop.permute.xlu0 %2423 }
 0x1a2   : > { %v2908_v0 = vsel %vm2892_vm9, %v2875_v63, %v2424_v19 }
 0x1a3   : > { %v2518_v44 = vpop.permute.xlu1 %2517 }
 0x1a4   : > { %v2955_v34 = vsel %vm2925_vm10, %v2922_v13, %v2518_v44 }
 0x1a5   : > { %v2502_v59 = vpop.permute.xlu0 %2501 }
 0x1a6   : > { %v2939_v62 = vsel %vm2925_vm10, %v2906_v28, %v2502_v59 }
 0x1a7   : > { %v2520_v22 = vpop.permute.xlu1 %2519 }
 0x1a8   : > { %v2957_v2 = vsel %vm2925_vm10, %v2924_v52, %v2520_v22 }
 0x1a9   : > { %v2504_v6 = vpop.permute.xlu0 %2503 }
 0x1aa   : > { %v2941_v11 = vsel %vm2925_vm10, %v2908_v0, %v2504_v6 }
 0x1ab   : > { %v2614_v18 = vpop.permute.xlu1 %2613 }
 0x1ac   : > { %v2988_v38 = vsel %vm2958_vm11, %v2955_v34, %v2614_v18 }
 0x1ad   : > { %v2598_v57 = vpop.permute.xlu0 %2597 }
 0x1ae   : > { %v2972_v47 = vsel %vm2958_vm11, %v2939_v62, %v2598_v57 }
 0x1af   : > { %v2616_v43 = vpop.permute.xlu1 %2615 }
 0x1b0   : > { %v2990_v46 = vsel %vm2958_vm11, %v2957_v2, %v2616_v43 }
 0x1b1   : > { %v5962_v8 = vpop.permute.xlu0 %2599 }
 0x1b2   : > { %v2974_v18 = vsel %vm2958_vm11, %v2941_v11, %v5962_v8 }
 0x1b6   : > { %v2694_v56 = vpop.permute.xlu1 %2693 }
 0x1b7   : > { %v3021_v33 = vsel %vm2991_vm12, %v2988_v38, %v2694_v56 }
 0x1b8   : > { %v2678_v9 = vpop.permute.xlu0 %2677 }
 0x1b9   : > { %v3005_v61 = vsel %vm2991_vm12, %v2972_v47, %v2678_v9 }
 0x1bb   : > { %v2696_v4 = vpop.permute.xlu1 %2695 }
 0x1bc   : > { %v3023_v35 = vsel %vm2991_vm12, %v2990_v46, %v2696_v4 }
 0x1be   : > { %v2680_v48 = vpop.permute.xlu0 %2679 }
 0x1bf   : > { %v2774_v37 = vpop.permute.xlu1 %2773  ;;  %v3007_v5 = vsel %vm2991_vm12, %v2974_v18, %v2680_v48 }
 0x1c0   : > { %v3054_v55 = vsel %vm3024_vm13, %v3021_v33, %v2774_v37 }
 0x1c1   : > { %v3975_v45 = vpop.f32.mrb[0].mxu0  ;;  %4001 = vmatprep.mubr.msk.bf16.mxu1 %vm3084_vm14, %v3054_v55 }
 0x1c2   : > { %v3164_v29 = vadd.f32 %v3975_v45, %v5988_v23  ;;  %v3991_v49 = vpop.f32.mrb[0].mxu1  ;;  %v3155_v41 = vpop.f32.mrb[1].mxu0 }
 0x1c3   : > { %v2758_v20 = vpop.permute.xlu0 %2757  ;;  %v3228_v53 = vadd.f32 %v3991_v49, %v5988_v23  ;;  %v3156_v12 = vadd.f32 %v5988_v23, %v3155_v41  ;;  %v3219_v60 = vpop.f32.mrb[1].mxu1 }
 0x1c4   : > { %v3038_v3 = vsel %vm3024_vm13, %v3005_v61, %v2758_v20  ;;  %v2776_v17 = vpop.permute.xlu1 %2775  ;;  %v3918_v21 = vpack.c.bf16 %v3164_v29, %v3164_v29  ;;  %v3220_v40 = vadd.f32 %v5988_v23, %v3219_v60  ;;  %v3976_v7 = vpop.f32.mrb[2].mxu0 }
 0x1c5   : > { %3985 = vmatprep.mubr.msk.bf16.mxu0 %vm3084_vm14, %v3038_v3  ;;  %v3056_v54 = vsel %vm3024_vm13, %v3023_v35, %v2776_v17  ;;  %v3934_v19 = vpack.c.bf16 %v3228_v53, %v3228_v53  ;;  %v3916_v44 = vpack.c.bf16 %v3156_v12, %v3156_v12  ;;  %v3167_v59 = vadd.f32 %v3976_v7, %v5988_v23  ;;  %v3992_v22 = vpop.f32.mrb[2].mxu1  ;;  %v3158_v6 = vpop.f32.mrb[3].mxu0 }
 0x1c6   : > { %4002 = vmatmul.mubr.msk.bf16.gmra.mrb[12].mxu1 %vm3084_vm14, %v3056_v54  ;;  %3413 = vst.msk [vmem:[%s6009_s12 + $0x8] sm:$0xf] %vm3410_vm0, %v3918_v21  ;;  %v3932_v57 = vpack.c.bf16 %v3220_v40, %v3220_v40  ;;  %v3231_v43 = vadd.f32 %v3992_v22, %v5988_v23  ;;  %v3159_v51 = vadd.f32 %v5988_v23, %v3158_v6  ;;  %v3222_v32 = vpop.f32.mrb[3].mxu1 }
 0x1c7   : > { %v2760_v56 = vpop.permute.xlu0 %2759  ;;  %3429 = vst.msk [vmem:[%s6009_s12 + $0x48] sm:$0xf] %vm3410_vm0, %v3934_v19  ;;  %3411 = vst.msk [vmem:[%s6009_s12] sm:$0xf] %vm3410_vm0, %v3916_v44  ;;  %v3919_v8 = vpack.c.bf16 %v3167_v59, %v3167_v59  ;;  %v3223_v14 = vadd.f32 %v5988_v23, %v3222_v32 }
 0x1c8   : > { %v3040_v39 = vsel %vm3024_vm13, %v3007_v5, %v2760_v56  ;;  %3427 = vst.msk [vmem:[%s6009_s12 + $0x40] sm:$0xf] %vm3410_vm0, %v3932_v57  ;;  %v3935_v42 = vpack.c.bf16 %v3231_v43, %v3231_v43  ;;  %v3917_v9 = vpack.c.bf16 %v3159_v51, %v3159_v51 }
 0x1c9   : > { %3986 = vmatmul.mubr.msk.bf16.gmra.mrb[12].mxu0 %vm3084_vm14, %v3040_v39  ;;  %3414 = vst.msk [vmem:[%s6009_s12 + $0xc] sm:$0xf] %vm3410_vm0, %v3919_v8  ;;  %v3933_v24 = vpack.c.bf16 %v3223_v14, %v3223_v14 }
 0x1ca   : > { %3430 = vst.msk [vmem:[%s6009_s12 + $0x4c] sm:$0xf] %vm3410_vm0, %v3935_v42  ;;  %3412 = vst.msk [vmem:[%s6009_s12 + $0x4] sm:$0xf] %vm3410_vm0, %v3917_v9 }
 0x1cb   : > { %3428 = vst.msk [vmem:[%s6009_s12 + $0x44] sm:$0xf] %vm3410_vm0, %v3933_v24 }
 0x210   : > { %v3995_v16 = vpop.f32.mrb[4].mxu1 }
 0x211   : > { %v3244_v58 = vadd.f32 %v3995_v16, %v5988_v23  ;;  %v3235_v25 = vpop.f32.mrb[5].mxu1 }
 0x212   : > { %v3979_v50 = vpop.f32.mrb[4].mxu0  ;;  %v3236_v13 = vadd.f32 %v5988_v23, %v3235_v25  ;;  %v3996_v36 = vpop.f32.mrb[6].mxu1 }
 0x213   : > { %v3180_v4 = vadd.f32 %v3979_v50, %v5988_v23  ;;  %v3171_v1 = vpop.f32.mrb[5].mxu0  ;;  %v3938_v30 = vpack.c.bf16 %v3244_v58, %v3244_v58  ;;  %v3247_v31 = vadd.f32 %v3996_v36, %v5988_v23  ;;  %v3238_v26 = vpop.f32.mrb[7].mxu1 }
 0x214   : > { %v3172_v15 = vadd.f32 %v5988_v23, %v3171_v1  ;;  %v3980_v34 = vpop.f32.mrb[6].mxu0  ;;  %v3936_v38 = vpack.c.bf16 %v3236_v13, %v3236_v13  ;;  %v3239_v63 = vadd.f32 %v5988_v23, %v3238_v26 }
 0x215   : > { %v3922_v27 = vpack.c.bf16 %v3180_v4, %v3180_v4  ;;  %v3183_v48 = vadd.f32 %v3980_v34, %v5988_v23  ;;  %v3174_v10 = vpop.f32.mrb[7].mxu0  ;;  %3433 = vst.msk [vmem:[%s6009_s12 + $0x58] sm:$0xf] %vm3410_vm0, %v3938_v30  ;;  %v3939_v33 = vpack.c.bf16 %v3247_v31, %v3247_v31 }
 0x216   : > { %v3920_v28 = vpack.c.bf16 %v3172_v15, %v3172_v15  ;;  %v3175_v37 = vadd.f32 %v5988_v23, %v3174_v10  ;;  %3431 = vst.msk [vmem:[%s6009_s12 + $0x50] sm:$0xf] %vm3410_vm0, %v3936_v38  ;;  %v3937_v0 = vpack.c.bf16 %v3239_v63, %v3239_v63 }
 0x217   : > { %3417 = vst.msk [vmem:[%s6009_s12 + $0x18] sm:$0xf] %vm3410_vm0, %v3922_v27  ;;  %v3923_v52 = vpack.c.bf16 %v3183_v48, %v3183_v48  ;;  %3434 = vst.msk [vmem:[%s6009_s12 + $0x5c] sm:$0xf] %vm3410_vm0, %v3939_v33 }
 0x218   : > { %3415 = vst.msk [vmem:[%s6009_s12 + $0x10] sm:$0xf] %vm3410_vm0, %v3920_v28  ;;  %v3921_v62 = vpack.c.bf16 %v3175_v37, %v3175_v37  ;;  %3432 = vst.msk [vmem:[%s6009_s12 + $0x54] sm:$0xf] %vm3410_vm0, %v3937_v0 }
 0x219   : > { %3418 = vst.msk [vmem:[%s6009_s12 + $0x1c] sm:$0xf] %vm3410_vm0, %v3923_v52 }
 0x21a   : > { %3416 = vst.msk [vmem:[%s6009_s12 + $0x14] sm:$0xf] %vm3410_vm0, %v3921_v62 }
 0x24f   : > { %v3999_v55 = vpop.f32.mrb[8].mxu1 }
 0x250   : > { %v3260_v45 = vadd.f32 %v3999_v55, %v5988_v23  ;;  %v3251_v2 = vpop.f32.mrb[9].mxu1 }
 0x251   : > { %v3252_v11 = vadd.f32 %v5988_v23, %v3251_v2  ;;  %v4000_v47 = vpop.f32.mrb[10].mxu1 }
 0x252   : > { %v3942_v29 = vpack.c.bf16 %v3260_v45, %v3260_v45  ;;  %v3263_v49 = vadd.f32 %v4000_v47, %v5988_v23  ;;  %v3254_v41 = vpop.f32.mrb[11].mxu1 }
 0x253   : > { %v3983_v46 = vpop.f32.mrb[8].mxu0  ;;  %v3940_v61 = vpack.c.bf16 %v3252_v11, %v3252_v11  ;;  %v3255_v20 = vadd.f32 %v5988_v23, %v3254_v41 }
 0x254   : > { %v3196_v53 = vadd.f32 %v3983_v46, %v5988_v23  ;;  %3437 = vst.msk [vmem:[%s6009_s12 + $0x68] sm:$0xf] %vm3410_vm0, %v3942_v29  ;;  %v3187_v12 = vpop.f32.mrb[9].mxu0  ;;  %v3943_v60 = vpack.c.bf16 %v3263_v49, %v3263_v49 }
 0x255   : > { %v3188_v35 = vadd.f32 %v5988_v23, %v3187_v12  ;;  %3435 = vst.msk [vmem:[%s6009_s12 + $0x60] sm:$0xf] %vm3410_vm0, %v3940_v61  ;;  %v3984_v3 = vpop.f32.mrb[10].mxu0  ;;  %v3941_v17 = vpack.c.bf16 %v3255_v20, %v3255_v20 }
 0x256   : > { %v3926_v21 = vpack.c.bf16 %v3196_v53, %v3196_v53  ;;  %v3199_v40 = vadd.f32 %v3984_v3, %v5988_v23  ;;  %3438 = vst.msk [vmem:[%s6009_s12 + $0x6c] sm:$0xf] %vm3410_vm0, %v3943_v60  ;;  %v3190_v7 = vpop.f32.mrb[11].mxu0 }
 0x257   : > { %v3924_v54 = vpack.c.bf16 %v3188_v35, %v3188_v35  ;;  %v3191_v19 = vadd.f32 %v5988_v23, %v3190_v7  ;;  %3436 = vst.msk [vmem:[%s6009_s12 + $0x64] sm:$0xf] %vm3410_vm0, %v3941_v17 }
 0x258   : > { %3421 = vst.msk [vmem:[%s6009_s12 + $0x28] sm:$0xf] %vm3410_vm0, %v3926_v21  ;;  %v3927_v44 = vpack.c.bf16 %v3199_v40, %v3199_v40 }
 0x259   : > { %3419 = vst.msk [vmem:[%s6009_s12 + $0x20] sm:$0xf] %vm3410_vm0, %v3924_v54  ;;  %v3925_v59 = vpack.c.bf16 %v3191_v19, %v3191_v19 }
 0x25a   : > { %3422 = vst.msk [vmem:[%s6009_s12 + $0x2c] sm:$0xf] %vm3410_vm0, %v3927_v44 }
 0x25b   : > { %3420 = vst.msk [vmem:[%s6009_s12 + $0x24] sm:$0xf] %vm3410_vm0, %v3925_v59 }
 0x299   : > { %v4003_v22 = vpop.f32.mrb[12].mxu1 }
 0x29a   : > { %v3276_v6 = vadd.f32 %v4003_v22, %v5988_v23  ;;  %v3267_v18 = vpop.f32.mrb[13].mxu1 }
 0x29b   : > { %v3268_v57 = vadd.f32 %v5988_v23, %v3267_v18  ;;  %v4004_v43 = vpop.f32.mrb[14].mxu1 }
 0x29c   : > { %v3987_v51 = vpop.f32.mrb[12].mxu0  ;;  %v3946_v32 = vpack.c.bf16 %v3276_v6, %v3276_v6  ;;  %v3279_v5 = vadd.f32 %v4004_v43, %v5988_v23  ;;  %v3270_v56 = vpop.f32.mrb[15].mxu1 }
 0x29d   : > { %v3212_v8 = vadd.f32 %v3987_v51, %v5988_v23  ;;  %v3203_v14 = vpop.f32.mrb[13].mxu0  ;;  %v3944_v39 = vpack.c.bf16 %v3268_v57, %v3268_v57  ;;  %v3271_v42 = vadd.f32 %v5988_v23, %v3270_v56 }
 0x29e   : > { %3441 = vst.msk [vmem:[%s6009_s12 + $0x78] sm:$0xf] %vm3410_vm0, %v3946_v32  ;;  %v3204_v9 = vadd.f32 %v5988_v23, %v3203_v14  ;;  %v3988_v24 = vpop.f32.mrb[14].mxu0  ;;  %v3947_v16 = vpack.c.bf16 %v3279_v5, %v3279_v5 }
 0x29f   : > { %v3930_v50 = vpack.c.bf16 %v3212_v8, %v3212_v8  ;;  %3439 = vst.msk [vmem:[%s6009_s12 + $0x70] sm:$0xf] %vm3410_vm0, %v3944_v39  ;;  %v3215_v58 = vadd.f32 %v3988_v24, %v5988_v23  ;;  %v3206_v25 = vpop.f32.mrb[15].mxu0  ;;  %v3945_v4 = vpack.c.bf16 %v3271_v42, %v3271_v42 }
 0x2a0   : > { %v3928_v1 = vpack.c.bf16 %v3204_v9, %v3204_v9  ;;  %3442 = vst.msk [vmem:[%s6009_s12 + $0x7c] sm:$0xf] %vm3410_vm0, %v3947_v16  ;;  %v3207_v13 = vadd.f32 %v5988_v23, %v3206_v25 }
 0x2a1   : > { %3425 = vst.msk [vmem:[%s6009_s12 + $0x38] sm:$0xf] %vm3410_vm0, %v3930_v50  ;;  %v3931_v36 = vpack.c.bf16 %v3215_v58, %v3215_v58  ;;  %3440 = vst.msk [vmem:[%s6009_s12 + $0x74] sm:$0xf] %vm3410_vm0, %v3945_v4 }
 0x2a2   : > { %3423 = vst.msk [vmem:[%s6009_s12 + $0x30] sm:$0xf] %vm3410_vm0, %v3928_v1  ;;  %v3929_v30 = vpack.c.bf16 %v3207_v13, %v3207_v13 }
 0x2a3   : > { %3426 = vst.msk [vmem:[%s6009_s12 + $0x3c] sm:$0xf] %vm3410_vm0, %v3931_v36 }
 0x2a4   : > { %3424 = vst.msk [vmem:[%s6009_s12 + $0x34] sm:$0xf] %vm3410_vm0, %v3929_v30 }
 0x2a5 PF: > { %s13_s14 = sadd.s32 1, %s4147_s14   ;;  %s6133_s12 = smov %s4143_s13 }
 0x2a6   : > { %p10_p5 = scmp.ge.s32.totalorder %s13_s14, 4   ;;  %s6134_s13 = smov %s6136_s15 }
 0x2a8   :  { %12 = sbr.rel (!%p10_p5) target bundleno = 2 (0x2), region = 64 }

</bundles_post_ra>
